<compile_context>
chip_gen: v5e
topology: v5e:2x2
jax: 0.10.0
libtpu: 0.0.40
codegen_flags: <defaults>
</compile_context>

<pallas_src>
import functools

import jax
import jax.numpy as jnp
from jax.experimental import pallas as pl
from jax.experimental.pallas import tpu as pltpu


# ----------------------------------------------------------------------------
# Fused Pallas kernel: num_layers LSTM layers + Linear(H, 1) head
# ----------------------------------------------------------------------------
def _make_fused_lstm_kernel(num_layers, hidden, seq_len, batch):
    H = hidden
    T = seq_len
    B = batch

    def kernel(*refs):
        # refs = (x2d, [w_ih_T, w_hh_T, b]*L, w_fc, b_fc, out, proj_scr, seq_scr)
        x_ref = refs[0]                                        # (T*B, D_in0)
        wih_refs = [refs[1 + 3 * l] for l in range(num_layers)]  # (D_in, 4H)
        whh_refs = [refs[2 + 3 * l] for l in range(num_layers)]  # (H, 4H)
        b_refs = [refs[3 + 3 * l] for l in range(num_layers)]    # (1, 4H)
        wfc_ref = refs[1 + 3 * num_layers]                     # (1, H)
        bfc_ref = refs[2 + 3 * num_layers]                     # (1, 1)
        out_ref = refs[3 + 3 * num_layers]                     # (B, 1)
        proj_ref = refs[4 + 3 * num_layers]                    # (T*B, 4H) f32
        seq_ref = refs[5 + 3 * num_layers]                     # (T*B, H)  f32

        # Hoisted constants (JAX does not CSE broadcast_in_dim).
        lane = jax.lax.broadcasted_iota(jnp.int32, (B, 4 * H), 1)
        g_mask = (lane >= 2 * H) & (lane < 3 * H)              # tanh block
        zeros = jnp.zeros((B, H), jnp.float32)

        h_last = zeros
        for layer in range(num_layers):
            # ---- Input projection for ALL timesteps: one MXU matmul, bias
            # folded in, completely off the serial recurrent path.
            inp = x_ref[...] if layer == 0 else seq_ref[...]
            proj_ref[...] = (
                jnp.dot(inp, wih_refs[layer][...],
                        preferred_element_type=jnp.float32)
                + b_refs[layer][...]
            )

            # Hoist the recurrent weights out of the time loop (4 vregs @ H=32).
            whh = whh_refs[layer][...]                         # (H, 4H)
            write_seq = layer < num_layers - 1                 # static

            def step(t, carry):
                h, c = carry
                row = pl.multiple_of(t * B, B)                 # sublane aligned
                # Recurrent dot only: (B, H) @ (H, 4H), K = H = 32.
                gates = proj_ref[pl.ds(row, B), :] + jnp.dot(
                    h, whh, preferred_element_type=jnp.float32)  # (B, 4H)
                # Packed activations: 2 full-width EUP pushes, lane-select g.
                acts = jnp.where(g_mask, jnp.tanh(gates), jax.nn.sigmoid(gates))
                i_g = acts[:, 0 * H:1 * H]
                f_g = acts[:, 1 * H:2 * H]
                g_g = acts[:, 2 * H:3 * H]
                o_g = acts[:, 3 * H:4 * H]
                c = f_g * c + i_g * g_g
                h = o_g * jnp.tanh(c)
                if write_seq:                                  # feed next layer
                    seq_ref[pl.ds(row, B), :] = h
                return (h, c)

            h_last, _ = jax.lax.fori_loop(0, T, step, (zeros, zeros),
                                          unroll=True)

        # fc head on the last layer's final hidden state: VPU multiply + lane
        # reduction (no degenerate N=1 MXU matmul, no extra launch).
        out = jnp.sum(h_last * wfc_ref[...], axis=-1, keepdims=True)
        out_ref[...] = out + bfc_ref[...]                      # (B, 1)

    return kernel


# ----------------------------------------------------------------------------
# Wrapper
# ----------------------------------------------------------------------------
@functools.partial(jax.jit, static_argnames=("num_layers",))
def lstm_model_forward(x, params, num_layers):
    """x: (B, T, input_size) -> (B,)   (matches PyTorch forward + squeeze)."""
    # batch_first (B, T, D) -> time-major, flattened to (T*B, D) so the kernel
    # can run the whole-sequence input projection as a single 2-D matmul and
    # index timestep t via an aligned sublane slice [t*B : (t+1)*B].
    x_tbd = jnp.transpose(x, (1, 0, 2)).astype(jnp.float32)
    T, B, D = x_tbd.shape
    x2d = x_tbd.reshape(T * B, D)
    hidden = params["fc"][0].shape[1]
    H4 = 4 * hidden

    # NOTE: zero-arg index_map lambdas are valid only because grid=() here; if
    # a grid / core_map axis is ever added they must take the grid indices.
    inputs = [x2d]
    in_specs = [pl.BlockSpec((T * B, D), lambda: (0, 0))]

    for layer in range(num_layers):
        w_ih, w_hh, b_ih, b_hh = params[f"lstm_l{layer}"]
        d_in = w_ih.shape[1]
        # Keep W_ih and W_hh separate; transpose once here (PyTorch stores
        # (4H, D_in) / (4H, H)).  Combined bias folded into the projection.
        inputs += [w_ih.T, w_hh.T, (b_ih + b_hh).reshape(1, H4)]
        in_specs += [
            pl.BlockSpec((d_in, H4), lambda: (0, 0)),
            pl.BlockSpec((hidden, H4), lambda: (0, 0)),
            pl.BlockSpec((1, H4), lambda: (0, 0)),
        ]

    w_fc, b_fc = params["fc"]
    inputs += [w_fc.reshape(1, hidden), b_fc.reshape(1, 1)]
    in_specs += [
        pl.BlockSpec((1, hidden), lambda: (0, 0)),
        pl.BlockSpec((1, 1), lambda: (0, 0)),
    ]

    out = pl.pallas_call(
        _make_fused_lstm_kernel(num_layers, hidden, T, B),
        out_shape=jax.ShapeDtypeStruct((B, 1), jnp.float32),
        in_specs=in_specs,
        out_specs=pl.BlockSpec((B, 1), lambda: (0, 0)),
        scratch_shapes=[
            pltpu.VMEM((T * B, H4), jnp.float32),     # per-layer input proj
            pltpu.VMEM((T * B, hidden), jnp.float32),  # inter-layer hidden seq
        ],
    )(*inputs)
    return jnp.squeeze(out, axis=-1)                           # (B,)


# ----------------------------------------------------------------------------
# Pure-JAX reference (for correctness check)
# ----------------------------------------------------------------------------
def lstm_model_ref(x, params, num_layers):
    def step(carry, xt, w_ih, w_hh, b):
        h, c = carry
        gates = xt @ w_ih.T + h @ w_hh.T + b
        H = h.shape[-1]
        i = jax.nn.sigmoid(gates[:, 0:H])
        f = jax.nn.sigmoid(gates[:, H:2 * H])
        g = jnp.tanh(gates[:, 2 * H:3 * H])
        o = jax.nn.sigmoid(gates[:, 3 * H:4 * H])
        c = f * c + i * g
        h = o * jnp.tanh(c)
        return (h, c), h

    seq = jnp.transpose(x, (1, 0, 2)).astype(jnp.float32)
    B = x.shape[0]
    for layer in range(num_layers):
        w_ih, w_hh, b_ih, b_hh = params[f"lstm_l{layer}"]
        H = w_hh.shape[1]
        init = (jnp.zeros((B, H), jnp.float32), jnp.zeros((B, H), jnp.float32))
        _, seq = jax.lax.scan(
            lambda carry, xt: step(carry, xt, w_ih, w_hh, b_ih + b_hh), init, seq
        )
    w_fc, b_fc = params["fc"]
    return jnp.squeeze(seq[-1] @ w_fc.T + b_fc)


# ----------------------------------------------------------------------------
# Parameter init (deterministic, PyTorch-style uniform(-1/sqrt(H), 1/sqrt(H)))
# ----------------------------------------------------------------------------
def init_params(key, input_size, hidden_size, num_layers):
    params = {}
    k = 1.0 / jnp.sqrt(hidden_size)
    for layer in range(num_layers):
        d_in = input_size if layer == 0 else hidden_size
        key, k1, k2, k3, k4 = jax.random.split(key, 5)
        params[f"lstm_l{layer}"] = (
            jax.random.uniform(k1, (4 * hidden_size, d_in), jnp.float32, -k, k),
            jax.random.uniform(k2, (4 * hidden_size, hidden_size), jnp.float32, -k, k),
            jax.random.uniform(k3, (4 * hidden_size,), jnp.float32, -k, k),
            jax.random.uniform(k4, (4 * hidden_size,), jnp.float32, -k, k),
        )
    key, k5, k6 = jax.random.split(key, 3)
    kf = 1.0 / jnp.sqrt(hidden_size)
    params["fc"] = (
        jax.random.uniform(k5, (1, hidden_size), jnp.float32, -kf, kf),
        jax.random.uniform(k6, (1,), jnp.float32, -kf, kf),
    )
    return params


# ----------------------------------------------------------------------------
if __name__ == "__main__":
    B, T, INPUT_SIZE, HIDDEN, NUM_LAYERS = 8, 8, 4, 32, 2
    key = jax.random.PRNGKey(0)
    key, kx = jax.random.split(key)
    x = jax.random.normal(kx, (B, T, INPUT_SIZE), jnp.float32)
    params = init_params(key, INPUT_SIZE, HIDDEN, NUM_LAYERS)

    out = lstm_model_forward(x, params, NUM_LAYERS)
    out = jax.block_until_ready(out)

    ref = lstm_model_ref(x, params, NUM_LAYERS)
    assert out.shape == (B,), out.shape
    assert jnp.allclose(out, ref, atol=1e-5, rtol=1e-5), (out, ref)

    print("KERNEL_OK")
</pallas_src>

<mosaic_0001>
module attributes {stable_mosaic.version = 11 : i64} {
  func.func @kernel(%arg0: memref<64x4xf32, #tpu.memory_space<vmem>>, %arg1: memref<4x128xf32, #tpu.memory_space<vmem>>, %arg2: memref<32x128xf32, #tpu.memory_space<vmem>>, %arg3: memref<1x128xf32, #tpu.memory_space<vmem>>, %arg4: memref<32x128xf32, #tpu.memory_space<vmem>>, %arg5: memref<32x128xf32, #tpu.memory_space<vmem>>, %arg6: memref<1x128xf32, #tpu.memory_space<vmem>>, %arg7: memref<1x32xf32, #tpu.memory_space<vmem>>, %arg8: memref<1x1xf32, #tpu.memory_space<vmem>>, %arg9: memref<8x1xf32, #tpu.memory_space<vmem>>, %arg10: memref<64x128xf32, #tpu.memory_space<vmem>>, %arg11: memref<64x32xf32, #tpu.memory_space<vmem>>) attributes {dimension_semantics = [], scalar_prefetch = 0 : i64, scratch_operands = 2 : i64, tpu.core_type = #tpu.core_type<tc>} {
    %0 = tpu.iota {dimensions = array<i32: 1>} : vector<8x128xi32>
    %c64_i32 = arith.constant 64 : i32
    %1 = vector.broadcast %c64_i32 : i32 to vector<8x128xi32>
    %2 = arith.cmpi sge, %0, %1 : vector<8x128xi32>
    %c96_i32 = arith.constant 96 : i32
    %3 = vector.broadcast %c96_i32 : i32 to vector<8x128xi32>
    %4 = arith.cmpi slt, %0, %3 : vector<8x128xi32>
    %5 = arith.andi %2, %4 : vector<8x128xi1>
    %cst = arith.constant 0.000000e+00 : f32
    %6 = vector.broadcast %cst : f32 to vector<8x32xf32>
    %c0 = arith.constant 0 : index
    %c0_0 = arith.constant 0 : index
    %7 = vector.load %arg0[%c0, %c0_0] : memref<64x4xf32, #tpu.memory_space<vmem>>, vector<64x4xf32>
    %c0_1 = arith.constant 0 : index
    %c0_2 = arith.constant 0 : index
    %8 = vector.load %arg1[%c0_1, %c0_2] : memref<4x128xf32, #tpu.memory_space<vmem>>, vector<4x128xf32>
    %cst_3 = arith.constant dense<0.000000e+00> : vector<64x128xf32>
    %9 = tpu.matmul %7, %8, %cst_3 {dimension_numbers = #tpu.dot_dimension_numbers<[1], [0], [0], [1], [0, 0, 1, 1], [], []>} : vector<64x4xf32>, vector<4x128xf32>, vector<64x128xf32> -> vector<64x128xf32>
    %c0_4 = arith.constant 0 : index
    %c0_5 = arith.constant 0 : index
    %10 = vector.load %arg3[%c0_4, %c0_5] : memref<1x128xf32, #tpu.memory_space<vmem>>, vector<1x128xf32>
    %11 = vector.broadcast %10 : vector<1x128xf32> to vector<64x128xf32>
    %12 = arith.addf %9, %11 : vector<64x128xf32>
    %c0_6 = arith.constant 0 : index
    %c0_7 = arith.constant 0 : index
    %13 = vector.load %arg10[%c0_6, %c0_7] : memref<64x128xf32, #tpu.memory_space<vmem>>, vector<64x128xf32>
    tpu.vector_store %arg10[%c0_6, %c0_7], %12 {strides = array<i32>} : memref<64x128xf32, #tpu.memory_space<vmem>>, vector<64x128xf32>,
    %c0_8 = arith.constant 0 : index
    %c0_9 = arith.constant 0 : index
    %14 = vector.load %arg2[%c0_8, %c0_9] : memref<32x128xf32, #tpu.memory_space<vmem>>, vector<32x128xf32>
    %c0_i32 = arith.constant 0 : i32
    %c8_i32 = arith.constant 8 : i32
    %15 = arith.muli %c0_i32, %c8_i32 : i32
    %16 = tpu.assume_multiple %15, 8 : i32
    %17 = arith.index_cast %16 : i32 to index
    %c0_10 = arith.constant 0 : index
    %18 = vector.load %arg10[%17, %c0_10] : memref<64x128xf32, #tpu.memory_space<vmem>>, vector<8x128xf32>
    %cst_11 = arith.constant dense<0.000000e+00> : vector<8x128xf32>
    %19 = tpu.matmul %6, %14, %cst_11 {dimension_numbers = #tpu.dot_dimension_numbers<[1], [0], [0], [1], [0, 0, 1, 1], [], []>} : vector<8x32xf32>, vector<32x128xf32>, vector<8x128xf32> -> vector<8x128xf32>
    %20 = arith.addf %18, %19 : vector<8x128xf32>
    %21 = math.tanh %20 : vector<8x128xf32>
    %22 = arith.negf %20 : vector<8x128xf32>
    %23 = math.exp %22 : vector<8x128xf32>
    %cst_12 = arith.constant 1.000000e+00 : f32
    %24 = vector.broadcast %cst_12 : f32 to vector<8x128xf32>
    %25 = arith.addf %24, %23 : vector<8x128xf32>
    %26 = arith.divf %24, %25 : vector<8x128xf32>
    %27 = arith.select %5, %21, %26 : vector<8x128xi1>, vector<8x128xf32>
    %28 = vector.extract_strided_slice %27 {offsets = [0, 0], sizes = [8, 32], strides = [1, 1]} : vector<8x128xf32> to vector<8x32xf32>
    %29 = vector.extract_strided_slice %27 {offsets = [0, 32], sizes = [8, 32], strides = [1, 1]} : vector<8x128xf32> to vector<8x32xf32>
    %30 = vector.extract_strided_slice %27 {offsets = [0, 64], sizes = [8, 32], strides = [1, 1]} : vector<8x128xf32> to vector<8x32xf32>
    %31 = vector.extract_strided_slice %27 {offsets = [0, 96], sizes = [8, 32], strides = [1, 1]} : vector<8x128xf32> to vector<8x32xf32>
    %32 = arith.mulf %29, %6 : vector<8x32xf32>
    %33 = arith.mulf %28, %30 : vector<8x32xf32>
    %34 = arith.addf %32, %33 : vector<8x32xf32>
    %35 = math.tanh %34 : vector<8x32xf32>
    %36 = arith.mulf %31, %35 : vector<8x32xf32>
    %37 = arith.index_cast %16 : i32 to index
    %c0_13 = arith.constant 0 : index
    %38 = vector.load %arg11[%37, %c0_13] : memref<64x32xf32, #tpu.memory_space<vmem>>, vector<8x32xf32>
    tpu.vector_store %arg11[%37, %c0_13], %36 {strides = array<i32>} : memref<64x32xf32, #tpu.memory_space<vmem>>, vector<8x32xf32>,
    %c1_i32 = arith.constant 1 : i32
    %c8_i32_14 = arith.constant 8 : i32
    %39 = arith.muli %c1_i32, %c8_i32_14 : i32
    %40 = tpu.assume_multiple %39, 8 : i32
    %41 = arith.index_cast %40 : i32 to index
    %c0_15 = arith.constant 0 : index
    %42 = vector.load %arg10[%41, %c0_15] : memref<64x128xf32, #tpu.memory_space<vmem>>, vector<8x128xf32>
    %cst_16 = arith.constant dense<0.000000e+00> : vector<8x128xf32>
    %43 = tpu.matmul %36, %14, %cst_16 {dimension_numbers = #tpu.dot_dimension_numbers<[1], [0], [0], [1], [0, 0, 1, 1], [], []>} : vector<8x32xf32>, vector<32x128xf32>, vector<8x128xf32> -> vector<8x128xf32>
    %44 = arith.addf %42, %43 : vector<8x128xf32>
    %45 = math.tanh %44 : vector<8x128xf32>
    %46 = arith.negf %44 : vector<8x128xf32>
    %47 = math.exp %46 : vector<8x128xf32>
    %cst_17 = arith.constant 1.000000e+00 : f32
    %48 = vector.broadcast %cst_17 : f32 to vector<8x128xf32>
    %49 = arith.addf %48, %47 : vector<8x128xf32>
    %50 = arith.divf %48, %49 : vector<8x128xf32>
    %51 = arith.select %5, %45, %50 : vector<8x128xi1>, vector<8x128xf32>
    %52 = vector.extract_strided_slice %51 {offsets = [0, 0], sizes = [8, 32], strides = [1, 1]} : vector<8x128xf32> to vector<8x32xf32>
    %53 = vector.extract_strided_slice %51 {offsets = [0, 32], sizes = [8, 32], strides = [1, 1]} : vector<8x128xf32> to vector<8x32xf32>
    %54 = vector.extract_strided_slice %51 {offsets = [0, 64], sizes = [8, 32], strides = [1, 1]} : vector<8x128xf32> to vector<8x32xf32>
    %55 = vector.extract_strided_slice %51 {offsets = [0, 96], sizes = [8, 32], strides = [1, 1]} : vector<8x128xf32> to vector<8x32xf32>
    %56 = arith.mulf %53, %34 : vector<8x32xf32>
    %57 = arith.mulf %52, %54 : vector<8x32xf32>
    %58 = arith.addf %56, %57 : vector<8x32xf32>
    %59 = math.tanh %58 : vector<8x32xf32>
    %60 = arith.mulf %55, %59 : vector<8x32xf32>
    %61 = arith.index_cast %40 : i32 to index
    %c0_18 = arith.constant 0 : index
    %62 = vector.load %arg11[%61, %c0_18] : memref<64x32xf32, #tpu.memory_space<vmem>>, vector<8x32xf32>
    tpu.vector_store %arg11[%61, %c0_18], %60 {strides = array<i32>} : memref<64x32xf32, #tpu.memory_space<vmem>>, vector<8x32xf32>,
    %c2_i32 = arith.constant 2 : i32
    %c8_i32_19 = arith.constant 8 : i32
    %63 = arith.muli %c2_i32, %c8_i32_19 : i32
    %64 = tpu.assume_multiple %63, 8 : i32
    %65 = arith.index_cast %64 : i32 to index
    %c0_20 = arith.constant 0 : index
    %66 = vector.load %arg10[%65, %c0_20] : memref<64x128xf32, #tpu.memory_space<vmem>>, vector<8x128xf32>
    %cst_21 = arith.constant dense<0.000000e+00> : vector<8x128xf32>
    %67 = tpu.matmul %60, %14, %cst_21 {dimension_numbers = #tpu.dot_dimension_numbers<[1], [0], [0], [1], [0, 0, 1, 1], [], []>} : vector<8x32xf32>, vector<32x128xf32>, vector<8x128xf32> -> vector<8x128xf32>
    %68 = arith.addf %66, %67 : vector<8x128xf32>
    %69 = math.tanh %68 : vector<8x128xf32>
    %70 = arith.negf %68 : vector<8x128xf32>
    %71 = math.exp %70 : vector<8x128xf32>
    %cst_22 = arith.constant 1.000000e+00 : f32
    %72 = vector.broadcast %cst_22 : f32 to vector<8x128xf32>
    %73 = arith.addf %72, %71 : vector<8x128xf32>
    %74 = arith.divf %72, %73 : vector<8x128xf32>
    %75 = arith.select %5, %69, %74 : vector<8x128xi1>, vector<8x128xf32>
    %76 = vector.extract_strided_slice %75 {offsets = [0, 0], sizes = [8, 32], strides = [1, 1]} : vector<8x128xf32> to vector<8x32xf32>
    %77 = vector.extract_strided_slice %75 {offsets = [0, 32], sizes = [8, 32], strides = [1, 1]} : vector<8x128xf32> to vector<8x32xf32>
    %78 = vector.extract_strided_slice %75 {offsets = [0, 64], sizes = [8, 32], strides = [1, 1]} : vector<8x128xf32> to vector<8x32xf32>
    %79 = vector.extract_strided_slice %75 {offsets = [0, 96], sizes = [8, 32], strides = [1, 1]} : vector<8x128xf32> to vector<8x32xf32>
    %80 = arith.mulf %77, %58 : vector<8x32xf32>
    %81 = arith.mulf %76, %78 : vector<8x32xf32>
    %82 = arith.addf %80, %81 : vector<8x32xf32>
    %83 = math.tanh %82 : vector<8x32xf32>
    %84 = arith.mulf %79, %83 : vector<8x32xf32>
    %85 = arith.index_cast %64 : i32 to index
    %c0_23 = arith.constant 0 : index
    %86 = vector.load %arg11[%85, %c0_23] : memref<64x32xf32, #tpu.memory_space<vmem>>, vector<8x32xf32>
    tpu.vector_store %arg11[%85, %c0_23], %84 {strides = array<i32>} : memref<64x32xf32, #tpu.memory_space<vmem>>, vector<8x32xf32>,
    %c3_i32 = arith.constant 3 : i32
    %c8_i32_24 = arith.constant 8 : i32
    %87 = arith.muli %c3_i32, %c8_i32_24 : i32
    %88 = tpu.assume_multiple %87, 8 : i32
    %89 = arith.index_cast %88 : i32 to index
    %c0_25 = arith.constant 0 : index
    %90 = vector.load %arg10[%89, %c0_25] : memref<64x128xf32, #tpu.memory_space<vmem>>, vector<8x128xf32>
    %cst_26 = arith.constant dense<0.000000e+00> : vector<8x128xf32>
    %91 = tpu.matmul %84, %14, %cst_26 {dimension_numbers = #tpu.dot_dimension_numbers<[1], [0], [0], [1], [0, 0, 1, 1], [], []>} : vector<8x32xf32>, vector<32x128xf32>, vector<8x128xf32> -> vector<8x128xf32>
    %92 = arith.addf %90, %91 : vector<8x128xf32>
    %93 = math.tanh %92 : vector<8x128xf32>
    %94 = arith.negf %92 : vector<8x128xf32>
    %95 = math.exp %94 : vector<8x128xf32>
    %cst_27 = arith.constant 1.000000e+00 : f32
    %96 = vector.broadcast %cst_27 : f32 to vector<8x128xf32>
    %97 = arith.addf %96, %95 : vector<8x128xf32>
    %98 = arith.divf %96, %97 : vector<8x128xf32>
    %99 = arith.select %5, %93, %98 : vector<8x128xi1>, vector<8x128xf32>
    %100 = vector.extract_strided_slice %99 {offsets = [0, 0], sizes = [8, 32], strides = [1, 1]} : vector<8x128xf32> to vector<8x32xf32>
    %101 = vector.extract_strided_slice %99 {offsets = [0, 32], sizes = [8, 32], strides = [1, 1]} : vector<8x128xf32> to vector<8x32xf32>
    %102 = vector.extract_strided_slice %99 {offsets = [0, 64], sizes = [8, 32], strides = [1, 1]} : vector<8x128xf32> to vector<8x32xf32>
    %103 = vector.extract_strided_slice %99 {offsets = [0, 96], sizes = [8, 32], strides = [1, 1]} : vector<8x128xf32> to vector<8x32xf32>
    %104 = arith.mulf %101, %82 : vector<8x32xf32>
    %105 = arith.mulf %100, %102 : vector<8x32xf32>
    %106 = arith.addf %104, %105 : vector<8x32xf32>
    %107 = math.tanh %106 : vector<8x32xf32>
    %108 = arith.mulf %103, %107 : vector<8x32xf32>
    %109 = arith.index_cast %88 : i32 to index
    %c0_28 = arith.constant 0 : index
    %110 = vector.load %arg11[%109, %c0_28] : memref<64x32xf32, #tpu.memory_space<vmem>>, vector<8x32xf32>
    tpu.vector_store %arg11[%109, %c0_28], %108 {strides = array<i32>} : memref<64x32xf32, #tpu.memory_space<vmem>>, vector<8x32xf32>,
    %c4_i32 = arith.constant 4 : i32
    %c8_i32_29 = arith.constant 8 : i32
    %111 = arith.muli %c4_i32, %c8_i32_29 : i32
    %112 = tpu.assume_multiple %111, 8 : i32
    %113 = arith.index_cast %112 : i32 to index
    %c0_30 = arith.constant 0 : index
    %114 = vector.load %arg10[%113, %c0_30] : memref<64x128xf32, #tpu.memory_space<vmem>>, vector<8x128xf32>
    %cst_31 = arith.constant dense<0.000000e+00> : vector<8x128xf32>
    %115 = tpu.matmul %108, %14, %cst_31 {dimension_numbers = #tpu.dot_dimension_numbers<[1], [0], [0], [1], [0, 0, 1, 1], [], []>} : vector<8x32xf32>, vector<32x128xf32>, vector<8x128xf32> -> vector<8x128xf32>
    %116 = arith.addf %114, %115 : vector<8x128xf32>
    %117 = math.tanh %116 : vector<8x128xf32>
    %118 = arith.negf %116 : vector<8x128xf32>
    %119 = math.exp %118 : vector<8x128xf32>
    %cst_32 = arith.constant 1.000000e+00 : f32
    %120 = vector.broadcast %cst_32 : f32 to vector<8x128xf32>
    %121 = arith.addf %120, %119 : vector<8x128xf32>
    %122 = arith.divf %120, %121 : vector<8x128xf32>
    %123 = arith.select %5, %117, %122 : vector<8x128xi1>, vector<8x128xf32>
    %124 = vector.extract_strided_slice %123 {offsets = [0, 0], sizes = [8, 32], strides = [1, 1]} : vector<8x128xf32> to vector<8x32xf32>
    %125 = vector.extract_strided_slice %123 {offsets = [0, 32], sizes = [8, 32], strides = [1, 1]} : vector<8x128xf32> to vector<8x32xf32>
    %126 = vector.extract_strided_slice %123 {offsets = [0, 64], sizes = [8, 32], strides = [1, 1]} : vector<8x128xf32> to vector<8x32xf32>
    %127 = vector.extract_strided_slice %123 {offsets = [0, 96], sizes = [8, 32], strides = [1, 1]} : vector<8x128xf32> to vector<8x32xf32>
    %128 = arith.mulf %125, %106 : vector<8x32xf32>
    %129 = arith.mulf %124, %126 : vector<8x32xf32>
    %130 = arith.addf %128, %129 : vector<8x32xf32>
    %131 = math.tanh %130 : vector<8x32xf32>
    %132 = arith.mulf %127, %131 : vector<8x32xf32>
    %133 = arith.index_cast %112 : i32 to index
    %c0_33 = arith.constant 0 : index
    %134 = vector.load %arg11[%133, %c0_33] : memref<64x32xf32, #tpu.memory_space<vmem>>, vector<8x32xf32>
    tpu.vector_store %arg11[%133, %c0_33], %132 {strides = array<i32>} : memref<64x32xf32, #tpu.memory_space<vmem>>, vector<8x32xf32>,
    %c5_i32 = arith.constant 5 : i32
    %c8_i32_34 = arith.constant 8 : i32
    %135 = arith.muli %c5_i32, %c8_i32_34 : i32
    %136 = tpu.assume_multiple %135, 8 : i32
    %137 = arith.index_cast %136 : i32 to index
    %c0_35 = arith.constant 0 : index
    %138 = vector.load %arg10[%137, %c0_35] : memref<64x128xf32, #tpu.memory_space<vmem>>, vector<8x128xf32>
    %cst_36 = arith.constant dense<0.000000e+00> : vector<8x128xf32>
    %139 = tpu.matmul %132, %14, %cst_36 {dimension_numbers = #tpu.dot_dimension_numbers<[1], [0], [0], [1], [0, 0, 1, 1], [], []>} : vector<8x32xf32>, vector<32x128xf32>, vector<8x128xf32> -> vector<8x128xf32>
    %140 = arith.addf %138, %139 : vector<8x128xf32>
    %141 = math.tanh %140 : vector<8x128xf32>
    %142 = arith.negf %140 : vector<8x128xf32>
    %143 = math.exp %142 : vector<8x128xf32>
    %cst_37 = arith.constant 1.000000e+00 : f32
    %144 = vector.broadcast %cst_37 : f32 to vector<8x128xf32>
    %145 = arith.addf %144, %143 : vector<8x128xf32>
    %146 = arith.divf %144, %145 : vector<8x128xf32>
    %147 = arith.select %5, %141, %146 : vector<8x128xi1>, vector<8x128xf32>
    %148 = vector.extract_strided_slice %147 {offsets = [0, 0], sizes = [8, 32], strides = [1, 1]} : vector<8x128xf32> to vector<8x32xf32>
    %149 = vector.extract_strided_slice %147 {offsets = [0, 32], sizes = [8, 32], strides = [1, 1]} : vector<8x128xf32> to vector<8x32xf32>
    %150 = vector.extract_strided_slice %147 {offsets = [0, 64], sizes = [8, 32], strides = [1, 1]} : vector<8x128xf32> to vector<8x32xf32>
    %151 = vector.extract_strided_slice %147 {offsets = [0, 96], sizes = [8, 32], strides = [1, 1]} : vector<8x128xf32> to vector<8x32xf32>
    %152 = arith.mulf %149, %130 : vector<8x32xf32>
    %153 = arith.mulf %148, %150 : vector<8x32xf32>
    %154 = arith.addf %152, %153 : vector<8x32xf32>
    %155 = math.tanh %154 : vector<8x32xf32>
    %156 = arith.mulf %151, %155 : vector<8x32xf32>
    %157 = arith.index_cast %136 : i32 to index
    %c0_38 = arith.constant 0 : index
    %158 = vector.load %arg11[%157, %c0_38] : memref<64x32xf32, #tpu.memory_space<vmem>>, vector<8x32xf32>
    tpu.vector_store %arg11[%157, %c0_38], %156 {strides = array<i32>} : memref<64x32xf32, #tpu.memory_space<vmem>>, vector<8x32xf32>,
    %c6_i32 = arith.constant 6 : i32
    %c8_i32_39 = arith.constant 8 : i32
    %159 = arith.muli %c6_i32, %c8_i32_39 : i32
    %160 = tpu.assume_multiple %159, 8 : i32
    %161 = arith.index_cast %160 : i32 to index
    %c0_40 = arith.constant 0 : index
    %162 = vector.load %arg10[%161, %c0_40] : memref<64x128xf32, #tpu.memory_space<vmem>>, vector<8x128xf32>
    %cst_41 = arith.constant dense<0.000000e+00> : vector<8x128xf32>
    %163 = tpu.matmul %156, %14, %cst_41 {dimension_numbers = #tpu.dot_dimension_numbers<[1], [0], [0], [1], [0, 0, 1, 1], [], []>} : vector<8x32xf32>, vector<32x128xf32>, vector<8x128xf32> -> vector<8x128xf32>
    %164 = arith.addf %162, %163 : vector<8x128xf32>
    %165 = math.tanh %164 : vector<8x128xf32>
    %166 = arith.negf %164 : vector<8x128xf32>
    %167 = math.exp %166 : vector<8x128xf32>
    %cst_42 = arith.constant 1.000000e+00 : f32
    %168 = vector.broadcast %cst_42 : f32 to vector<8x128xf32>
    %169 = arith.addf %168, %167 : vector<8x128xf32>
    %170 = arith.divf %168, %169 : vector<8x128xf32>
    %171 = arith.select %5, %165, %170 : vector<8x128xi1>, vector<8x128xf32>
    %172 = vector.extract_strided_slice %171 {offsets = [0, 0], sizes = [8, 32], strides = [1, 1]} : vector<8x128xf32> to vector<8x32xf32>
    %173 = vector.extract_strided_slice %171 {offsets = [0, 32], sizes = [8, 32], strides = [1, 1]} : vector<8x128xf32> to vector<8x32xf32>
    %174 = vector.extract_strided_slice %171 {offsets = [0, 64], sizes = [8, 32], strides = [1, 1]} : vector<8x128xf32> to vector<8x32xf32>
    %175 = vector.extract_strided_slice %171 {offsets = [0, 96], sizes = [8, 32], strides = [1, 1]} : vector<8x128xf32> to vector<8x32xf32>
    %176 = arith.mulf %173, %154 : vector<8x32xf32>
    %177 = arith.mulf %172, %174 : vector<8x32xf32>
    %178 = arith.addf %176, %177 : vector<8x32xf32>
    %179 = math.tanh %178 : vector<8x32xf32>
    %180 = arith.mulf %175, %179 : vector<8x32xf32>
    %181 = arith.index_cast %160 : i32 to index
    %c0_43 = arith.constant 0 : index
    %182 = vector.load %arg11[%181, %c0_43] : memref<64x32xf32, #tpu.memory_space<vmem>>, vector<8x32xf32>
    tpu.vector_store %arg11[%181, %c0_43], %180 {strides = array<i32>} : memref<64x32xf32, #tpu.memory_space<vmem>>, vector<8x32xf32>,
    %c7_i32 = arith.constant 7 : i32
    %c8_i32_44 = arith.constant 8 : i32
    %183 = arith.muli %c7_i32, %c8_i32_44 : i32
    %184 = tpu.assume_multiple %183, 8 : i32
    %185 = arith.index_cast %184 : i32 to index
    %c0_45 = arith.constant 0 : index
    %186 = vector.load %arg10[%185, %c0_45] : memref<64x128xf32, #tpu.memory_space<vmem>>, vector<8x128xf32>
    %cst_46 = arith.constant dense<0.000000e+00> : vector<8x128xf32>
    %187 = tpu.matmul %180, %14, %cst_46 {dimension_numbers = #tpu.dot_dimension_numbers<[1], [0], [0], [1], [0, 0, 1, 1], [], []>} : vector<8x32xf32>, vector<32x128xf32>, vector<8x128xf32> -> vector<8x128xf32>
    %188 = arith.addf %186, %187 : vector<8x128xf32>
    %189 = math.tanh %188 : vector<8x128xf32>
    %190 = arith.negf %188 : vector<8x128xf32>
    %191 = math.exp %190 : vector<8x128xf32>
    %cst_47 = arith.constant 1.000000e+00 : f32
    %192 = vector.broadcast %cst_47 : f32 to vector<8x128xf32>
    %193 = arith.addf %192, %191 : vector<8x128xf32>
    %194 = arith.divf %192, %193 : vector<8x128xf32>
    %195 = arith.select %5, %189, %194 : vector<8x128xi1>, vector<8x128xf32>
    %196 = vector.extract_strided_slice %195 {offsets = [0, 0], sizes = [8, 32], strides = [1, 1]} : vector<8x128xf32> to vector<8x32xf32>
    %197 = vector.extract_strided_slice %195 {offsets = [0, 32], sizes = [8, 32], strides = [1, 1]} : vector<8x128xf32> to vector<8x32xf32>
    %198 = vector.extract_strided_slice %195 {offsets = [0, 64], sizes = [8, 32], strides = [1, 1]} : vector<8x128xf32> to vector<8x32xf32>
    %199 = vector.extract_strided_slice %195 {offsets = [0, 96], sizes = [8, 32], strides = [1, 1]} : vector<8x128xf32> to vector<8x32xf32>
    %200 = arith.mulf %197, %178 : vector<8x32xf32>
    %201 = arith.mulf %196, %198 : vector<8x32xf32>
    %202 = arith.addf %200, %201 : vector<8x32xf32>
    %203 = math.tanh %202 : vector<8x32xf32>
    %204 = arith.mulf %199, %203 : vector<8x32xf32>
    %205 = arith.index_cast %184 : i32 to index
    %c0_48 = arith.constant 0 : index
    %206 = vector.load %arg11[%205, %c0_48] : memref<64x32xf32, #tpu.memory_space<vmem>>, vector<8x32xf32>
    tpu.vector_store %arg11[%205, %c0_48], %204 {strides = array<i32>} : memref<64x32xf32, #tpu.memory_space<vmem>>, vector<8x32xf32>,
    %c8_i32_49 = arith.constant 8 : i32
    %c0_50 = arith.constant 0 : index
    %c0_51 = arith.constant 0 : index
    %207 = vector.load %arg11[%c0_50, %c0_51] : memref<64x32xf32, #tpu.memory_space<vmem>>, vector<64x32xf32>
    %c0_52 = arith.constant 0 : index
    %c0_53 = arith.constant 0 : index
    %208 = vector.load %arg4[%c0_52, %c0_53] : memref<32x128xf32, #tpu.memory_space<vmem>>, vector<32x128xf32>
    %cst_54 = arith.constant dense<0.000000e+00> : vector<64x128xf32>
    %209 = tpu.matmul %207, %208, %cst_54 {dimension_numbers = #tpu.dot_dimension_numbers<[1], [0], [0], [1], [0, 0, 1, 1], [], []>} : vector<64x32xf32>, vector<32x128xf32>, vector<64x128xf32> -> vector<64x128xf32>
    %c0_55 = arith.constant 0 : index
    %c0_56 = arith.constant 0 : index
    %210 = vector.load %arg6[%c0_55, %c0_56] : memref<1x128xf32, #tpu.memory_space<vmem>>, vector<1x128xf32>
    %211 = vector.broadcast %210 : vector<1x128xf32> to vector<64x128xf32>
    %212 = arith.addf %209, %211 : vector<64x128xf32>
    %c0_57 = arith.constant 0 : index
    %c0_58 = arith.constant 0 : index
    %213 = vector.load %arg10[%c0_57, %c0_58] : memref<64x128xf32, #tpu.memory_space<vmem>>, vector<64x128xf32>
    tpu.vector_store %arg10[%c0_57, %c0_58], %212 {strides = array<i32>} : memref<64x128xf32, #tpu.memory_space<vmem>>, vector<64x128xf32>,
    %c0_59 = arith.constant 0 : index
    %c0_60 = arith.constant 0 : index
    %214 = vector.load %arg5[%c0_59, %c0_60] : memref<32x128xf32, #tpu.memory_space<vmem>>, vector<32x128xf32>
    %c0_i32_61 = arith.constant 0 : i32
    %c8_i32_62 = arith.constant 8 : i32
    %215 = arith.muli %c0_i32_61, %c8_i32_62 : i32
    %216 = tpu.assume_multiple %215, 8 : i32
    %217 = arith.index_cast %216 : i32 to index
    %c0_63 = arith.constant 0 : index
    %218 = vector.load %arg10[%217, %c0_63] : memref<64x128xf32, #tpu.memory_space<vmem>>, vector<8x128xf32>
    %cst_64 = arith.constant dense<0.000000e+00> : vector<8x128xf32>
    %219 = tpu.matmul %6, %214, %cst_64 {dimension_numbers = #tpu.dot_dimension_numbers<[1], [0], [0], [1], [0, 0, 1, 1], [], []>} : vector<8x32xf32>, vector<32x128xf32>, vector<8x128xf32> -> vector<8x128xf32>
    %220 = arith.addf %218, %219 : vector<8x128xf32>
    %221 = math.tanh %220 : vector<8x128xf32>
    %222 = arith.negf %220 : vector<8x128xf32>
    %223 = math.exp %222 : vector<8x128xf32>
    %cst_65 = arith.constant 1.000000e+00 : f32
    %224 = vector.broadcast %cst_65 : f32 to vector<8x128xf32>
    %225 = arith.addf %224, %223 : vector<8x128xf32>
    %226 = arith.divf %224, %225 : vector<8x128xf32>
    %227 = arith.select %5, %221, %226 : vector<8x128xi1>, vector<8x128xf32>
    %228 = vector.extract_strided_slice %227 {offsets = [0, 0], sizes = [8, 32], strides = [1, 1]} : vector<8x128xf32> to vector<8x32xf32>
    %229 = vector.extract_strided_slice %227 {offsets = [0, 32], sizes = [8, 32], strides = [1, 1]} : vector<8x128xf32> to vector<8x32xf32>
    %230 = vector.extract_strided_slice %227 {offsets = [0, 64], sizes = [8, 32], strides = [1, 1]} : vector<8x128xf32> to vector<8x32xf32>
    %231 = vector.extract_strided_slice %227 {offsets = [0, 96], sizes = [8, 32], strides = [1, 1]} : vector<8x128xf32> to vector<8x32xf32>
    %232 = arith.mulf %229, %6 : vector<8x32xf32>
    %233 = arith.mulf %228, %230 : vector<8x32xf32>
    %234 = arith.addf %232, %233 : vector<8x32xf32>
    %235 = math.tanh %234 : vector<8x32xf32>
    %236 = arith.mulf %231, %235 : vector<8x32xf32>
    %c1_i32_66 = arith.constant 1 : i32
    %c8_i32_67 = arith.constant 8 : i32
    %237 = arith.muli %c1_i32_66, %c8_i32_67 : i32
    %238 = tpu.assume_multiple %237, 8 : i32
    %239 = arith.index_cast %238 : i32 to index
    %c0_68 = arith.constant 0 : index
    %240 = vector.load %arg10[%239, %c0_68] : memref<64x128xf32, #tpu.memory_space<vmem>>, vector<8x128xf32>
    %cst_69 = arith.constant dense<0.000000e+00> : vector<8x128xf32>
    %241 = tpu.matmul %236, %214, %cst_69 {dimension_numbers = #tpu.dot_dimension_numbers<[1], [0], [0], [1], [0, 0, 1, 1], [], []>} : vector<8x32xf32>, vector<32x128xf32>, vector<8x128xf32> -> vector<8x128xf32>
    %242 = arith.addf %240, %241 : vector<8x128xf32>
    %243 = math.tanh %242 : vector<8x128xf32>
    %244 = arith.negf %242 : vector<8x128xf32>
    %245 = math.exp %244 : vector<8x128xf32>
    %cst_70 = arith.constant 1.000000e+00 : f32
    %246 = vector.broadcast %cst_70 : f32 to vector<8x128xf32>
    %247 = arith.addf %246, %245 : vector<8x128xf32>
    %248 = arith.divf %246, %247 : vector<8x128xf32>
    %249 = arith.select %5, %243, %248 : vector<8x128xi1>, vector<8x128xf32>
    %250 = vector.extract_strided_slice %249 {offsets = [0, 0], sizes = [8, 32], strides = [1, 1]} : vector<8x128xf32> to vector<8x32xf32>
    %251 = vector.extract_strided_slice %249 {offsets = [0, 32], sizes = [8, 32], strides = [1, 1]} : vector<8x128xf32> to vector<8x32xf32>
    %252 = vector.extract_strided_slice %249 {offsets = [0, 64], sizes = [8, 32], strides = [1, 1]} : vector<8x128xf32> to vector<8x32xf32>
    %253 = vector.extract_strided_slice %249 {offsets = [0, 96], sizes = [8, 32], strides = [1, 1]} : vector<8x128xf32> to vector<8x32xf32>
    %254 = arith.mulf %251, %234 : vector<8x32xf32>
    %255 = arith.mulf %250, %252 : vector<8x32xf32>
    %256 = arith.addf %254, %255 : vector<8x32xf32>
    %257 = math.tanh %256 : vector<8x32xf32>
    %258 = arith.mulf %253, %257 : vector<8x32xf32>
    %c2_i32_71 = arith.constant 2 : i32
    %c8_i32_72 = arith.constant 8 : i32
    %259 = arith.muli %c2_i32_71, %c8_i32_72 : i32
    %260 = tpu.assume_multiple %259, 8 : i32
    %261 = arith.index_cast %260 : i32 to index
    %c0_73 = arith.constant 0 : index
    %262 = vector.load %arg10[%261, %c0_73] : memref<64x128xf32, #tpu.memory_space<vmem>>, vector<8x128xf32>
    %cst_74 = arith.constant dense<0.000000e+00> : vector<8x128xf32>
    %263 = tpu.matmul %258, %214, %cst_74 {dimension_numbers = #tpu.dot_dimension_numbers<[1], [0], [0], [1], [0, 0, 1, 1], [], []>} : vector<8x32xf32>, vector<32x128xf32>, vector<8x128xf32> -> vector<8x128xf32>
    %264 = arith.addf %262, %263 : vector<8x128xf32>
    %265 = math.tanh %264 : vector<8x128xf32>
    %266 = arith.negf %264 : vector<8x128xf32>
    %267 = math.exp %266 : vector<8x128xf32>
    %cst_75 = arith.constant 1.000000e+00 : f32
    %268 = vector.broadcast %cst_75 : f32 to vector<8x128xf32>
    %269 = arith.addf %268, %267 : vector<8x128xf32>
    %270 = arith.divf %268, %269 : vector<8x128xf32>
    %271 = arith.select %5, %265, %270 : vector<8x128xi1>, vector<8x128xf32>
    %272 = vector.extract_strided_slice %271 {offsets = [0, 0], sizes = [8, 32], strides = [1, 1]} : vector<8x128xf32> to vector<8x32xf32>
    %273 = vector.extract_strided_slice %271 {offsets = [0, 32], sizes = [8, 32], strides = [1, 1]} : vector<8x128xf32> to vector<8x32xf32>
    %274 = vector.extract_strided_slice %271 {offsets = [0, 64], sizes = [8, 32], strides = [1, 1]} : vector<8x128xf32> to vector<8x32xf32>
    %275 = vector.extract_strided_slice %271 {offsets = [0, 96], sizes = [8, 32], strides = [1, 1]} : vector<8x128xf32> to vector<8x32xf32>
    %276 = arith.mulf %273, %256 : vector<8x32xf32>
    %277 = arith.mulf %272, %274 : vector<8x32xf32>
    %278 = arith.addf %276, %277 : vector<8x32xf32>
    %279 = math.tanh %278 : vector<8x32xf32>
    %280 = arith.mulf %275, %279 : vector<8x32xf32>
    %c3_i32_76 = arith.constant 3 : i32
    %c8_i32_77 = arith.constant 8 : i32
    %281 = arith.muli %c3_i32_76, %c8_i32_77 : i32
    %282 = tpu.assume_multiple %281, 8 : i32
    %283 = arith.index_cast %282 : i32 to index
    %c0_78 = arith.constant 0 : index
    %284 = vector.load %arg10[%283, %c0_78] : memref<64x128xf32, #tpu.memory_space<vmem>>, vector<8x128xf32>
    %cst_79 = arith.constant dense<0.000000e+00> : vector<8x128xf32>
    %285 = tpu.matmul %280, %214, %cst_79 {dimension_numbers = #tpu.dot_dimension_numbers<[1], [0], [0], [1], [0, 0, 1, 1], [], []>} : vector<8x32xf32>, vector<32x128xf32>, vector<8x128xf32> -> vector<8x128xf32>
    %286 = arith.addf %284, %285 : vector<8x128xf32>
    %287 = math.tanh %286 : vector<8x128xf32>
    %288 = arith.negf %286 : vector<8x128xf32>
    %289 = math.exp %288 : vector<8x128xf32>
    %cst_80 = arith.constant 1.000000e+00 : f32
    %290 = vector.broadcast %cst_80 : f32 to vector<8x128xf32>
    %291 = arith.addf %290, %289 : vector<8x128xf32>
    %292 = arith.divf %290, %291 : vector<8x128xf32>
    %293 = arith.select %5, %287, %292 : vector<8x128xi1>, vector<8x128xf32>
    %294 = vector.extract_strided_slice %293 {offsets = [0, 0], sizes = [8, 32], strides = [1, 1]} : vector<8x128xf32> to vector<8x32xf32>
    %295 = vector.extract_strided_slice %293 {offsets = [0, 32], sizes = [8, 32], strides = [1, 1]} : vector<8x128xf32> to vector<8x32xf32>
    %296 = vector.extract_strided_slice %293 {offsets = [0, 64], sizes = [8, 32], strides = [1, 1]} : vector<8x128xf32> to vector<8x32xf32>
    %297 = vector.extract_strided_slice %293 {offsets = [0, 96], sizes = [8, 32], strides = [1, 1]} : vector<8x128xf32> to vector<8x32xf32>
    %298 = arith.mulf %295, %278 : vector<8x32xf32>
    %299 = arith.mulf %294, %296 : vector<8x32xf32>
    %300 = arith.addf %298, %299 : vector<8x32xf32>
    %301 = math.tanh %300 : vector<8x32xf32>
    %302 = arith.mulf %297, %301 : vector<8x32xf32>
    %c4_i32_81 = arith.constant 4 : i32
    %c8_i32_82 = arith.constant 8 : i32
    %303 = arith.muli %c4_i32_81, %c8_i32_82 : i32
    %304 = tpu.assume_multiple %303, 8 : i32
    %305 = arith.index_cast %304 : i32 to index
    %c0_83 = arith.constant 0 : index
    %306 = vector.load %arg10[%305, %c0_83] : memref<64x128xf32, #tpu.memory_space<vmem>>, vector<8x128xf32>
    %cst_84 = arith.constant dense<0.000000e+00> : vector<8x128xf32>
    %307 = tpu.matmul %302, %214, %cst_84 {dimension_numbers = #tpu.dot_dimension_numbers<[1], [0], [0], [1], [0, 0, 1, 1], [], []>} : vector<8x32xf32>, vector<32x128xf32>, vector<8x128xf32> -> vector<8x128xf32>
    %308 = arith.addf %306, %307 : vector<8x128xf32>
    %309 = math.tanh %308 : vector<8x128xf32>
    %310 = arith.negf %308 : vector<8x128xf32>
    %311 = math.exp %310 : vector<8x128xf32>
    %cst_85 = arith.constant 1.000000e+00 : f32
    %312 = vector.broadcast %cst_85 : f32 to vector<8x128xf32>
    %313 = arith.addf %312, %311 : vector<8x128xf32>
    %314 = arith.divf %312, %313 : vector<8x128xf32>
    %315 = arith.select %5, %309, %314 : vector<8x128xi1>, vector<8x128xf32>
    %316 = vector.extract_strided_slice %315 {offsets = [0, 0], sizes = [8, 32], strides = [1, 1]} : vector<8x128xf32> to vector<8x32xf32>
    %317 = vector.extract_strided_slice %315 {offsets = [0, 32], sizes = [8, 32], strides = [1, 1]} : vector<8x128xf32> to vector<8x32xf32>
    %318 = vector.extract_strided_slice %315 {offsets = [0, 64], sizes = [8, 32], strides = [1, 1]} : vector<8x128xf32> to vector<8x32xf32>
    %319 = vector.extract_strided_slice %315 {offsets = [0, 96], sizes = [8, 32], strides = [1, 1]} : vector<8x128xf32> to vector<8x32xf32>
    %320 = arith.mulf %317, %300 : vector<8x32xf32>
    %321 = arith.mulf %316, %318 : vector<8x32xf32>
    %322 = arith.addf %320, %321 : vector<8x32xf32>
    %323 = math.tanh %322 : vector<8x32xf32>
    %324 = arith.mulf %319, %323 : vector<8x32xf32>
    %c5_i32_86 = arith.constant 5 : i32
    %c8_i32_87 = arith.constant 8 : i32
    %325 = arith.muli %c5_i32_86, %c8_i32_87 : i32
    %326 = tpu.assume_multiple %325, 8 : i32
    %327 = arith.index_cast %326 : i32 to index
    %c0_88 = arith.constant 0 : index
    %328 = vector.load %arg10[%327, %c0_88] : memref<64x128xf32, #tpu.memory_space<vmem>>, vector<8x128xf32>
    %cst_89 = arith.constant dense<0.000000e+00> : vector<8x128xf32>
    %329 = tpu.matmul %324, %214, %cst_89 {dimension_numbers = #tpu.dot_dimension_numbers<[1], [0], [0], [1], [0, 0, 1, 1], [], []>} : vector<8x32xf32>, vector<32x128xf32>, vector<8x128xf32> -> vector<8x128xf32>
    %330 = arith.addf %328, %329 : vector<8x128xf32>
    %331 = math.tanh %330 : vector<8x128xf32>
    %332 = arith.negf %330 : vector<8x128xf32>
    %333 = math.exp %332 : vector<8x128xf32>
    %cst_90 = arith.constant 1.000000e+00 : f32
    %334 = vector.broadcast %cst_90 : f32 to vector<8x128xf32>
    %335 = arith.addf %334, %333 : vector<8x128xf32>
    %336 = arith.divf %334, %335 : vector<8x128xf32>
    %337 = arith.select %5, %331, %336 : vector<8x128xi1>, vector<8x128xf32>
    %338 = vector.extract_strided_slice %337 {offsets = [0, 0], sizes = [8, 32], strides = [1, 1]} : vector<8x128xf32> to vector<8x32xf32>
    %339 = vector.extract_strided_slice %337 {offsets = [0, 32], sizes = [8, 32], strides = [1, 1]} : vector<8x128xf32> to vector<8x32xf32>
    %340 = vector.extract_strided_slice %337 {offsets = [0, 64], sizes = [8, 32], strides = [1, 1]} : vector<8x128xf32> to vector<8x32xf32>
    %341 = vector.extract_strided_slice %337 {offsets = [0, 96], sizes = [8, 32], strides = [1, 1]} : vector<8x128xf32> to vector<8x32xf32>
    %342 = arith.mulf %339, %322 : vector<8x32xf32>
    %343 = arith.mulf %338, %340 : vector<8x32xf32>
    %344 = arith.addf %342, %343 : vector<8x32xf32>
    %345 = math.tanh %344 : vector<8x32xf32>
    %346 = arith.mulf %341, %345 : vector<8x32xf32>
    %c6_i32_91 = arith.constant 6 : i32
    %c8_i32_92 = arith.constant 8 : i32
    %347 = arith.muli %c6_i32_91, %c8_i32_92 : i32
    %348 = tpu.assume_multiple %347, 8 : i32
    %349 = arith.index_cast %348 : i32 to index
    %c0_93 = arith.constant 0 : index
    %350 = vector.load %arg10[%349, %c0_93] : memref<64x128xf32, #tpu.memory_space<vmem>>, vector<8x128xf32>
    %cst_94 = arith.constant dense<0.000000e+00> : vector<8x128xf32>
    %351 = tpu.matmul %346, %214, %cst_94 {dimension_numbers = #tpu.dot_dimension_numbers<[1], [0], [0], [1], [0, 0, 1, 1], [], []>} : vector<8x32xf32>, vector<32x128xf32>, vector<8x128xf32> -> vector<8x128xf32>
    %352 = arith.addf %350, %351 : vector<8x128xf32>
    %353 = math.tanh %352 : vector<8x128xf32>
    %354 = arith.negf %352 : vector<8x128xf32>
    %355 = math.exp %354 : vector<8x128xf32>
    %cst_95 = arith.constant 1.000000e+00 : f32
    %356 = vector.broadcast %cst_95 : f32 to vector<8x128xf32>
    %357 = arith.addf %356, %355 : vector<8x128xf32>
    %358 = arith.divf %356, %357 : vector<8x128xf32>
    %359 = arith.select %5, %353, %358 : vector<8x128xi1>, vector<8x128xf32>
    %360 = vector.extract_strided_slice %359 {offsets = [0, 0], sizes = [8, 32], strides = [1, 1]} : vector<8x128xf32> to vector<8x32xf32>
    %361 = vector.extract_strided_slice %359 {offsets = [0, 32], sizes = [8, 32], strides = [1, 1]} : vector<8x128xf32> to vector<8x32xf32>
    %362 = vector.extract_strided_slice %359 {offsets = [0, 64], sizes = [8, 32], strides = [1, 1]} : vector<8x128xf32> to vector<8x32xf32>
    %363 = vector.extract_strided_slice %359 {offsets = [0, 96], sizes = [8, 32], strides = [1, 1]} : vector<8x128xf32> to vector<8x32xf32>
    %364 = arith.mulf %361, %344 : vector<8x32xf32>
    %365 = arith.mulf %360, %362 : vector<8x32xf32>
    %366 = arith.addf %364, %365 : vector<8x32xf32>
    %367 = math.tanh %366 : vector<8x32xf32>
    %368 = arith.mulf %363, %367 : vector<8x32xf32>
    %c7_i32_96 = arith.constant 7 : i32
    %c8_i32_97 = arith.constant 8 : i32
    %369 = arith.muli %c7_i32_96, %c8_i32_97 : i32
    %370 = tpu.assume_multiple %369, 8 : i32
    %371 = arith.index_cast %370 : i32 to index
    %c0_98 = arith.constant 0 : index
    %372 = vector.load %arg10[%371, %c0_98] : memref<64x128xf32, #tpu.memory_space<vmem>>, vector<8x128xf32>
    %cst_99 = arith.constant dense<0.000000e+00> : vector<8x128xf32>
    %373 = tpu.matmul %368, %214, %cst_99 {dimension_numbers = #tpu.dot_dimension_numbers<[1], [0], [0], [1], [0, 0, 1, 1], [], []>} : vector<8x32xf32>, vector<32x128xf32>, vector<8x128xf32> -> vector<8x128xf32>
    %374 = arith.addf %372, %373 : vector<8x128xf32>
    %375 = math.tanh %374 : vector<8x128xf32>
    %376 = arith.negf %374 : vector<8x128xf32>
    %377 = math.exp %376 : vector<8x128xf32>
    %cst_100 = arith.constant 1.000000e+00 : f32
    %378 = vector.broadcast %cst_100 : f32 to vector<8x128xf32>
    %379 = arith.addf %378, %377 : vector<8x128xf32>
    %380 = arith.divf %378, %379 : vector<8x128xf32>
    %381 = arith.select %5, %375, %380 : vector<8x128xi1>, vector<8x128xf32>
    %382 = vector.extract_strided_slice %381 {offsets = [0, 0], sizes = [8, 32], strides = [1, 1]} : vector<8x128xf32> to vector<8x32xf32>
    %383 = vector.extract_strided_slice %381 {offsets = [0, 32], sizes = [8, 32], strides = [1, 1]} : vector<8x128xf32> to vector<8x32xf32>
    %384 = vector.extract_strided_slice %381 {offsets = [0, 64], sizes = [8, 32], strides = [1, 1]} : vector<8x128xf32> to vector<8x32xf32>
    %385 = vector.extract_strided_slice %381 {offsets = [0, 96], sizes = [8, 32], strides = [1, 1]} : vector<8x128xf32> to vector<8x32xf32>
    %386 = arith.mulf %383, %366 : vector<8x32xf32>
    %387 = arith.mulf %382, %384 : vector<8x32xf32>
    %388 = arith.addf %386, %387 : vector<8x32xf32>
    %389 = math.tanh %388 : vector<8x32xf32>
    %390 = arith.mulf %385, %389 : vector<8x32xf32>
    %c8_i32_101 = arith.constant 8 : i32
    %c0_102 = arith.constant 0 : index
    %c0_103 = arith.constant 0 : index
    %391 = vector.load %arg7[%c0_102, %c0_103] : memref<1x32xf32, #tpu.memory_space<vmem>>, vector<1x32xf32>
    %392 = vector.broadcast %391 : vector<1x32xf32> to vector<8x32xf32>
    %393 = arith.mulf %390, %392 : vector<8x32xf32>
    %cst_104 = arith.constant dense<0.000000e+00> : vector<8xf32>
    %394 = vector.multi_reduction <add>, %393, %cst_104 [1] : vector<8x32xf32> to vector<8xf32>
    %395 = vector.shape_cast %394 : vector<8xf32> to vector<8x1xf32>
    %c0_105 = arith.constant 0 : index
    %c0_106 = arith.constant 0 : index
    %396 = vector.load %arg8[%c0_105, %c0_106] : memref<1x1xf32, #tpu.memory_space<vmem>>, vector<1x1xf32>
    %397 = vector.broadcast %396 : vector<1x1xf32> to vector<8x1xf32>
    %398 = arith.addf %395, %397 : vector<8x1xf32>
    %c0_107 = arith.constant 0 : index
    %c0_108 = arith.constant 0 : index
    %399 = vector.load %arg9[%c0_107, %c0_108] : memref<8x1xf32, #tpu.memory_space<vmem>>, vector<8x1xf32>
    tpu.vector_store %arg9[%c0_107, %c0_108], %398 {strides = array<i32>} : memref<8x1xf32, #tpu.memory_space<vmem>>, vector<8x1xf32>,
    return
  }
}

</mosaic_0001>

<bundles_post_ra>
// kernel: lstm_model_forward.1
= control target key start
LH: loop header
LB: loop body
LE: loop exit
PB: predicated region body
PF: predicated region fallthrough
CT: control target
= control target key end

     0   :  { %vm77_vm0 = vcmask 1043456   ;;  %vm52_vm1 = vcmask 31744   ;;  %v1503_v6 = vmov 0.0   ;;  %v34_v15 = vlaneseq  ;;  %s1504_s21 = smov 64   ;;  %s1505_s22 = smov 32   ;;  %s1893_s2 = inlined_call_operand.vmem [shape: f32[32,128], index: 2, kind: input, shape index: {}]   ;;  %s1894_s1 = inlined_call_operand.vmem [shape: f32[4,128], index: 1, kind: input, shape index: {}]   ;;  %s1895_s0 = inlined_call_operand.vmem [shape: f32[64,4], index: 0, kind: input, shape index: {}]   ;;  %s1896_s3 = inlined_call_operand.vmem [shape: f32[1,128], index: 3, kind: input, shape index: {}]   ;;  %s1897_s4 = inlined_call_operand.vmem [shape: f32[32,128], index: 4, kind: input, shape index: {}]   ;;  %s1898_s6 = inlined_call_operand.vmem [shape: f32[1,128], index: 6, kind: input, shape index: {}]   ;;  %s1899_s5 = inlined_call_operand.vmem [shape: f32[32,128], index: 5, kind: input, shape index: {}]   ;;  %s1900_s7 = inlined_call_operand.vmem [shape: f32[1,32], index: 7, kind: input, shape index: {}]   ;;  %s1901_s8 = inlined_call_operand.<no memory space> [shape: f32[1,1], index: 8, kind: input, shape index: {}]   ;;  %s1902_s9 = inlined_call_operand.vmem [shape: f32[8,1], index: 9, kind: output, shape index: {}]  }
   0x1   :  { %v1560_v0 = vld [vmem:[%s1893_s2 + $0x18] sm:$0xff]  ;;  %v1565_v1 = vld [vmem:[%s1893_s2 + $0x10] sm:$0xff]  ;;  %v47_v2 = vld [vmem:[%s1894_s1] sm:$0xf]  ;;  %vm135_vm9 = vcmask 261120  }
   0x2   :  { %151 = vmatpush.msra.mxu1 %v1560_v0  ;;  %1319 = vmatpush.msk.msra.mxu0 %vm77_vm0, %v47_v2  ;;  %v39_v3 = vld [vmem:[%s1895_s0] sm:$0xff]  ;;  %v1577_v4 = vld [vmem:[%s1893_s2 + $0x8] sm:$0xff]  ;;  %v35_v17 = vand.u32 127, %v34_v15  ;;  %v697_v38 = vld [vmem:[%s1897_s4 + $0x18] sm:$0xff] }
   0x3   :  { %1320 = vmatmul.msk.f32.vlgmr.msra.gmra.mxu0 %vm52_vm1, %v39_v3  ;;  %219 = vmatpush.msra.mxu2 %v1560_v0  ;;  %v1585_v5 = vld [vmem:[%s1893_s2] sm:$0xff]  ;;  %v696_v39 = vld [vmem:[%s1897_s4 + $0x10] sm:$0xff]  ;;  %v40_v40 = vld [vmem:[%s1895_s0 + $0x8] sm:$0xff] }
   0x4   :  { %152 = vmatpush.msra.mxu1 %v1565_v1  ;;  %v1608_v7 = vld [vmem:[%s1896_s3] ss:$0 sm:$0xff]  ;;  %vm36_vm2 = vcmp.ge.s32.totalorder %v35_v17, 64  ;;  %vm37_vm3 = vcmp.lt.s32.totalorder %v35_v17, 96  ;;  %738 = vmatpush.msra.mxu3 %v697_v38  ;;  %v695_v41 = vld [vmem:[%s1897_s4 + $0x8] sm:$0xff] }
   0x5   :  { %220 = vmatpush.msra.mxu2 %v1565_v1  ;;  %vm1611_vm5 = vmand %vm36_vm2, %vm37_vm3  ;;  %v694_v42 = vld [vmem:[%s1897_s4] sm:$0xff]  ;;  %s1506_s4 = smov 96  }
   0x6   :  { %153 = vmatpush.msra.mxu1 %v1577_v4  ;;  %739 = vmatpush.msra.mxu3 %v696_v39 }
   0x7   :  { %221 = vmatpush.msra.mxu2 %v1577_v4 }
   0x8   :  { %154 = vmatpush.msra.mxu1 %v1585_v5  ;;  %740 = vmatpush.msra.mxu3 %v695_v41 }
   0x9   :  { %155 = vmatmul.f32.vlgmr.msra.gmra.mxu1 %v1503_v6  ;;  %222 = vmatpush.msra.mxu2 %v1585_v5 }
   0xa   :  { %288 = vmatpush.msrb.mxu1 %v1560_v0  ;;  %741 = vmatpush.msra.mxu3 %v694_v42 }
   0xb   :  { %426 = vmatpush.msrb.mxu2 %v1560_v0  ;;  %1321 = vmatmul.msk.f32.gmra.mxu0 %vm52_vm1, %v40_v40 }
   0xc   :  { %289 = vmatpush.msrb.mxu1 %v1565_v1 }
   0xd   :  { %427 = vmatpush.msrb.mxu2 %v1565_v1 }
   0xe   :  { %290 = vmatpush.msrb.mxu1 %v1577_v4 }
   0xf   :  { %428 = vmatpush.msrb.mxu2 %v1577_v4 }
  0x10   :  { %291 = vmatpush.msrb.mxu1 %v1585_v5 }
  0x11   :  { %429 = vmatpush.msrb.mxu2 %v1585_v5 }
  0x12   :  { %357 = vmatpush.msra.mxu1 %v1560_v0 }
  0x14   :  { %358 = vmatpush.msra.mxu1 %v1565_v1 }
  0x16   :  { %359 = vmatpush.msra.mxu1 %v1577_v4 }
  0x18   :  { %360 = vmatpush.msra.mxu1 %v1585_v5 }
  0x80   :  { %v98_v8 = vpop.f32.mrf.mxu0 }
  0x81   :  { %v99_v9 = vadd.f32 %v1608_v7, %v98_v8 }
  0x86   :  { %v156_v10 = vpop.f32.mrf.mxu1 }
  0x87   :  { %v159_v11 = vadd.f32 %v156_v10, %v99_v9 }
  0x88   :  { %v101_v45 = vpop.f32.mrf.mxu0 }
  0x89   :  { %v1328_v12 = vmul.f32 -1.442695, %v159_v11  ;;  %v102_v46 = vadd.f32 %v1608_v7, %v101_v45 }
  0x8b   :  { %1374 = vpow2.f32 %v1328_v12  ;;  %v41_v12 = vld [vmem:[%s1895_s0 + $0x10] sm:$0xff] }
  0x8c   :  { %1322 = vmatmul.msk.f32.gmra.mxu0 %vm52_vm1, %v41_v12 }
  0x91   :  { %v1375_v13 = vpop.eup %1374 }
  0x92   :  { %v164_v14 = vadd.f32 1.0, %v1375_v13 }
  0x94   :  { %1376 = vrcp.f32 %v164_v14  ;;  %v176_v20 = vand.u32 2147483648, %v164_v14  ;;  %v174_v22 = vand.u32 2147483647, %v164_v14  ;;  %vm170_vm6 = vweird.f32 %v164_v14 }
  0x95   :  { %1378 = vtanh.f32 %v159_v11 }
  0x96   :  { %v177_v25 = vor.u32 1.1754944e-38, %v176_v20  ;;  %vm175_vm8 = vcmp.eq.f32.partialorder %v174_v22, 8.507059e+37 }
  0x9a   :  { %v1377_v16 = vpop.eup %1376 }
  0x9b   :  { %v166_v18 = vmul.f32 %v1377_v16, %v164_v14  ;;  %vm171_vm4 = vweird.f32 %v1377_v16  ;;  %v1379_v27 = vpop.eup %1378 }
  0x9c   :  { %vm172_vm7 = vmor %vm170_vm6, %vm171_vm4 }
  0x9d   :  { %v167_v19 = vsub.f32 1.0, %v166_v18 }
  0x9f   :  { %v168_v21 = vmul.f32 %v1377_v16, %v167_v19 }
  0xa1   :  { %v169_v24 = vadd.f32 %v1377_v16, %v168_v21 }
  0xa3   :  { %v173_v26 = vsel %vm172_vm7, %v1377_v16, %v169_v24 }
  0xa4   :  { %v178_v28 = vsel %vm175_vm8, %v177_v25, %v173_v26 }
  0xa5   :  { %v180_v29 = vsel %vm1611_vm5, %v1379_v27, %v178_v28 }
  0xa6   :  { %183 = vrot.lane.b32.xlu0 %v180_v29, %s1504_s21  ;;  %v181_v32 = vmul.f32 0.0, %v180_v29 }
 0x109   :  { %v104_v17 = vpop.f32.mrf.mxu0 }
 0x10a   :  { %v105_v18 = vadd.f32 %v1608_v7, %v104_v17  ;;  %v43_v17 = vld [vmem:[%s1895_s0 + $0x20] sm:$0xff] }
 0x118   :  { %v184_v30 = vpop.permute.xlu0 %183 }
 0x119   :  { %v186_v31 = vmul.f32 %v184_v30, %v180_v29 }
 0x11b   :  { %188 = vrot.lane.b32.xlu0 %v186_v31, %s1505_s22 }
 0x18d   :  { %v189_v33 = vpop.permute.xlu0 %188 }
 0x18e   :  { %v191_v34 = vadd.f32 %v189_v33, %v181_v32 }
 0x190   :  { %1380 = vtanh.f32 %v191_v34 }
 0x196   :  { %v1381_v35 = vpop.eup %1380 }
 0x197   :  { %194 = vrot.lane.b32.xlu1 %v1381_v35, %s1504_s21 }
 0x209   :  { %v195_v36 = vpop.permute.xlu1 %194 }
 0x20a   :  { %v197_v37 = vmul.f32 %v195_v36, %v180_v29 }
 0x20c   :  { %199 = vrot.lane.b32.xlu1 %v197_v37, %s1505_s22 }
 0x27e   :  { %v200_v43 = vpop.permute.xlu1 %199 }
 0x27f   :  { %202 = vst.msk [vmem:[#allocation3] sm:$0xff] %vm135_vm9, %v200_v43  ;;  %1329 = vmatmul.msk.f32.vlgmr.msra.gmra.mxu2 %vm135_vm9, %v200_v43  ;;  %v42_v43 = vld [vmem:[%s1895_s0 + $0x18] sm:$0xff] }
 0x280   :  { %495 = vmatpush.msra.mxu2 %v1560_v0  ;;  %1323 = vmatmul.msk.f32.gmra.mxu0 %vm52_vm1, %v42_v43 }
 0x282   :  { %496 = vmatpush.msra.mxu2 %v1565_v1 }
 0x284   :  { %497 = vmatpush.msra.mxu2 %v1577_v4 }
 0x286   :  { %v686_v44 = vld [vmem:[#allocation3] sm:$0xff]  ;;  %498 = vmatpush.msra.mxu2 %v1585_v5 }
 0x287   :  { %1343 = vmatmul.msk.f32.vlgmr.msra.gmra.mxu3 %vm135_vm9, %v686_v44 }
 0x288   :  { %1324 = vmatmul.msk.f32.gmra.mxu0 %vm52_vm1, %v43_v17  ;;  %v1725_v17 = vld [vmem:[%s1899_s5 + $0x18] sm:$0xff] }
 0x302   :  { %v224_v47 = vpop.f32.mrf.mxu2 }
 0x303   :  { %v227_v48 = vadd.f32 %v224_v47, %v102_v46 }
 0x305   :  { %v1330_v49 = vmul.f32 -1.442695, %v227_v48 }
 0x307   :  { %1382 = vpow2.f32 %v1330_v49 }
 0x30d   :  { %v1383_v50 = vpop.eup %1382 }
 0x30e   :  { %v232_v51 = vadd.f32 1.0, %v1383_v50 }
 0x310   :  { %1384 = vrcp.f32 %v232_v51  ;;  %v244_v55 = vand.u32 2147483648, %v232_v51  ;;  %v242_v57 = vand.u32 2147483647, %v232_v51  ;;  %vm238_vm11 = vweird.f32 %v232_v51 }
 0x311   :  { %1386 = vtanh.f32 %v227_v48  ;;  %v107_v48 = vpop.f32.mrf.mxu0 }
 0x312   :  { %v245_v59 = vor.u32 1.1754944e-38, %v244_v55  ;;  %vm243_vm13 = vcmp.eq.f32.partialorder %v242_v57, 8.507059e+37  ;;  %v108_v49 = vadd.f32 %v1608_v7, %v107_v48 }
 0x316   :  { %v1385_v52 = vpop.eup %1384 }
 0x317   :  { %v234_v53 = vmul.f32 %v1385_v52, %v232_v51  ;;  %vm239_vm10 = vweird.f32 %v1385_v52  ;;  %v1387_v61 = vpop.eup %1386 }
 0x318   :  { %vm240_vm12 = vmor %vm238_vm11, %vm239_vm10 }
 0x319   :  { %v235_v54 = vsub.f32 1.0, %v234_v53 }
 0x31b   :  { %v236_v56 = vmul.f32 %v1385_v52, %v235_v54 }
 0x31d   :  { %v237_v58 = vadd.f32 %v1385_v52, %v236_v56 }
 0x31f   :  { %v241_v60 = vsel %vm240_vm12, %v1385_v52, %v237_v58 }
 0x320   :  { %v246_v62 = vsel %vm243_vm13, %v245_v59, %v241_v60 }
 0x321   :  { %v248_v63 = vsel %vm1611_vm5, %v1387_v61, %v246_v62 }
 0x322   :  { %251 = vrot.lane.b32.xlu2 %v248_v63, %s1504_s21  ;;  %v249_v8 = vmul.f32 %v248_v63, %v191_v34 }
 0x37c   :  { %v252_v2 = vpop.permute.xlu2 %251 }
 0x37d   :  { %v254_v3 = vmul.f32 %v252_v2, %v248_v63 }
 0x37f   :  { %256 = vrot.lane.b32.xlu2 %v254_v3, %s1505_s22 }
 0x3d9   :  { %v257_v9 = vpop.permute.xlu2 %256 }
 0x3da   :  { %v259_v10 = vadd.f32 %v257_v9, %v249_v8 }
 0x3dc   :  { %1388 = vtanh.f32 %v259_v10 }
 0x3e2   :  { %v1389_v11 = vpop.eup %1388 }
 0x3e3   :  { %262 = vrot.lane.b32.xlu0 %v1389_v11, %s1504_s21 }
 0x455   :  { %v263_v13 = vpop.permute.xlu0 %262 }
 0x456   :  { %v265_v14 = vmul.f32 %v263_v13, %v248_v63 }
 0x458   :  { %267 = vrot.lane.b32.xlu1 %v265_v14, %s1505_s22 }
 0x4ca   :  { %v268_v15 = vpop.permute.xlu1 %267 }
 0x4cb   :  { %271 = vst.msk [vmem:[#allocation3 + $0x8] sm:$0xff] %vm135_vm9, %v268_v15  ;;  %1331 = vmatmul.msk.f32.vlgmr.msrb.gmra.mxu1 %vm135_vm9, %v268_v15 }
 0x4cc   :  { %564 = vmatpush.msrb.mxu1 %v1560_v0 }
 0x4ce   :  { %565 = vmatpush.msrb.mxu1 %v1565_v1 }
 0x4d0   :  { %566 = vmatpush.msrb.mxu1 %v1577_v4 }
 0x4d2   :  { %v687_v16 = vld [vmem:[#allocation3 + $0x8] sm:$0xff]  ;;  %567 = vmatpush.msrb.mxu1 %v1585_v5 }
 0x4d3   :  { %1344 = vmatmul.msk.f32.gmra.mxu3 %vm135_vm9, %v687_v16 }
 0x548   :  { %v293_v19 = vpop.f32.mrf.mxu1 }
 0x549   :  { %v296_v20 = vadd.f32 %v293_v19, %v105_v18 }
 0x54b   :  { %v1332_v21 = vmul.f32 -1.442695, %v296_v20 }
 0x54d   :  { %1390 = vpow2.f32 %v1332_v21 }
 0x553   :  { %v1391_v22 = vpop.eup %1390 }
 0x554   :  { %v301_v24 = vadd.f32 1.0, %v1391_v22 }
 0x556   :  { %1392 = vrcp.f32 %v301_v24  ;;  %v313_v28 = vand.u32 2147483648, %v301_v24  ;;  %v311_v30 = vand.u32 2147483647, %v301_v24  ;;  %vm307_vm15 = vweird.f32 %v301_v24 }
 0x557   :  { %1394 = vtanh.f32 %v296_v20  ;;  %v110_v20 = vpop.f32.mrf.mxu0 }
 0x558   :  { %v314_v32 = vor.u32 1.1754944e-38, %v313_v28  ;;  %vm312_vm2 = vcmp.eq.f32.partialorder %v311_v30, 8.507059e+37  ;;  %v111_v21 = vadd.f32 %v1608_v7, %v110_v20  ;;  %v1744_v20 = vld [vmem:[%s1899_s5] sm:$0xff] }
 0x55c   :  { %v1393_v25 = vpop.eup %1392 }
 0x55d   :  { %v303_v26 = vmul.f32 %v1393_v25, %v301_v24  ;;  %vm308_vm14 = vweird.f32 %v1393_v25  ;;  %v1395_v34 = vpop.eup %1394 }
 0x55e   :  { %vm309_vm0 = vmor %vm307_vm15, %vm308_vm14 }
 0x55f   :  { %v304_v27 = vsub.f32 1.0, %v303_v26 }
 0x561   :  { %v305_v29 = vmul.f32 %v1393_v25, %v304_v27 }
 0x563   :  { %v306_v31 = vadd.f32 %v1393_v25, %v305_v29 }
 0x565   :  { %v310_v33 = vsel %vm309_vm0, %v1393_v25, %v306_v31 }
 0x566   :  { %v315_v35 = vsel %vm312_vm2, %v314_v32, %v310_v33 }
 0x567   :  { %v317_v36 = vsel %vm1611_vm5, %v1395_v34, %v315_v35 }
 0x568   :  { %320 = vrot.lane.b32.xlu2 %v317_v36, %s1504_s21  ;;  %v318_v39 = vmul.f32 %v317_v36, %v259_v10 }
 0x5c2   :  { %v321_v37 = vpop.permute.xlu2 %320 }
 0x5c3   :  { %v323_v38 = vmul.f32 %v321_v37, %v317_v36 }
 0x5c5   :  { %325 = vrot.lane.b32.xlu0 %v323_v38, %s1505_s22 }
 0x637   :  { %v326_v40 = vpop.permute.xlu0 %325 }
 0x638   :  { %v328_v41 = vadd.f32 %v326_v40, %v318_v39 }
 0x63a   :  { %1396 = vtanh.f32 %v328_v41 }
 0x640   :  { %v1397_v42 = vpop.eup %1396 }
 0x641   :  { %331 = vrot.lane.b32.xlu1 %v1397_v42, %s1504_s21 }
 0x6b3   :  { %v332_v44 = vpop.permute.xlu1 %331 }
 0x6b4   :  { %v334_v45 = vmul.f32 %v332_v44, %v317_v36  ;;  %v44_v44 = vld [vmem:[%s1895_s0 + $0x28] sm:$0xff] }
 0x6b5   :  { %1325 = vmatmul.msk.f32.gmra.mxu0 %vm52_vm1, %v44_v44 }
 0x6b6   :  { %336 = vrot.lane.b32.xlu2 %v334_v45, %s1505_s22 }
 0x710   :  { %v337_v46 = vpop.permute.xlu2 %336 }
 0x711   :  { %340 = vst.msk [vmem:[#allocation3 + $0x10] sm:$0xff] %vm135_vm9, %v337_v46  ;;  %1333 = vmatmul.msk.f32.vlgmr.msra.gmra.mxu1 %vm135_vm9, %v337_v46 }
 0x712   :  { %792 = vmatpush.msra.mxu1 %v1725_v17 }
 0x718   :  { %v688_v47 = vld [vmem:[#allocation3 + $0x10] sm:$0xff] }
 0x719   :  { %1345 = vmatmul.msk.f32.gmra.mxu3 %vm135_vm9, %v688_v47 }
 0x732   :  { %v113_v47 = vpop.f32.mrf.mxu0 }
 0x733   :  { %v114_v48 = vadd.f32 %v1608_v7, %v113_v47 }
 0x78e   :  { %v362_v50 = vpop.f32.mrf.mxu1 }
 0x78f   :  { %v365_v51 = vadd.f32 %v362_v50, %v108_v49 }
 0x791   :  { %v1334_v52 = vmul.f32 -1.442695, %v365_v51 }
 0x793   :  { %1398 = vpow2.f32 %v1334_v52 }
 0x799   :  { %v1399_v53 = vpop.eup %1398 }
 0x79a   :  { %v370_v54 = vadd.f32 1.0, %v1399_v53 }
 0x79c   :  { %1400 = vrcp.f32 %v370_v54  ;;  %v382_v58 = vand.u32 2147483648, %v370_v54  ;;  %v380_v60 = vand.u32 2147483647, %v370_v54  ;;  %vm376_vm4 = vweird.f32 %v370_v54 }
 0x79d   :  { %1402 = vtanh.f32 %v365_v51 }
 0x79e   :  { %v383_v62 = vor.u32 1.1754944e-38, %v382_v58  ;;  %vm381_vm7 = vcmp.eq.f32.partialorder %v380_v60, 8.507059e+37 }
 0x7a2   :  { %v1401_v55 = vpop.eup %1400 }
 0x7a3   :  { %v372_v56 = vmul.f32 %v1401_v55, %v370_v54  ;;  %vm377_vm3 = vweird.f32 %v1401_v55  ;;  %v1403_v2 = vpop.eup %1402 }
 0x7a4   :  { %vm378_vm6 = vmor %vm376_vm4, %vm377_vm3 }
 0x7a5   :  { %v373_v57 = vsub.f32 1.0, %v372_v56 }
 0x7a7   :  { %v374_v59 = vmul.f32 %v1401_v55, %v373_v57 }
 0x7a9   :  { %v375_v61 = vadd.f32 %v1401_v55, %v374_v59 }
 0x7ab   :  { %v379_v63 = vsel %vm378_vm6, %v1401_v55, %v375_v61 }
 0x7ac   :  { %v384_v3 = vsel %vm381_vm7, %v383_v62, %v379_v63 }
 0x7ad   :  { %v386_v8 = vsel %vm1611_vm5, %v1403_v2, %v384_v3 }
 0x7ae   :  { %389 = vrot.lane.b32.xlu0 %v386_v8, %s1504_s21  ;;  %v387_v11 = vmul.f32 %v386_v8, %v328_v41 }
 0x820   :  { %v390_v9 = vpop.permute.xlu0 %389 }
 0x821   :  { %v392_v10 = vmul.f32 %v390_v9, %v386_v8 }
 0x823   :  { %394 = vrot.lane.b32.xlu1 %v392_v10, %s1505_s22 }
 0x895   :  { %v395_v12 = vpop.permute.xlu1 %394 }
 0x896   :  { %v397_v13 = vadd.f32 %v395_v12, %v387_v11 }
 0x898   :  { %1404 = vtanh.f32 %v397_v13 }
 0x89e   :  { %v1405_v14 = vpop.eup %1404 }
 0x89f   :  { %400 = vrot.lane.b32.xlu2 %v1405_v14, %s1504_s21  ;;  %v45_v14 = vld [vmem:[%s1895_s0 + $0x30] sm:$0xff] }
 0x8a0   :  { %1326 = vmatmul.msk.f32.gmra.mxu0 %vm52_vm1, %v45_v14 }
 0x8f9   :  { %v401_v15 = vpop.permute.xlu2 %400 }
 0x8fa   :  { %v403_v16 = vmul.f32 %v401_v15, %v386_v8 }
 0x8fc   :  { %405 = vrot.lane.b32.xlu0 %v403_v16, %s1505_s22 }
 0x96e   :  { %v406_v18 = vpop.permute.xlu0 %405 }
 0x96f   :  { %409 = vst.msk [vmem:[#allocation3 + $0x18] sm:$0xff] %vm135_vm9, %v406_v18  ;;  %1335 = vmatmul.msk.f32.vlgmr.msrb.gmra.mxu2 %vm135_vm9, %v406_v18  ;;  %v1730_v18 = vld [vmem:[%s1899_s5 + $0x10] sm:$0xff] }
 0x970   :  { %633 = vmatpush.msrb.mxu2 %v1560_v0  ;;  %793 = vmatpush.msra.mxu1 %v1730_v18 }
 0x972   :  { %634 = vmatpush.msrb.mxu2 %v1565_v1 }
 0x974   :  { %635 = vmatpush.msrb.mxu2 %v1577_v4 }
 0x976   :  { %v689_v19 = vld [vmem:[#allocation3 + $0x18] sm:$0xff]  ;;  %636 = vmatpush.msrb.mxu2 %v1585_v5 }
 0x977   :  { %1346 = vmatmul.msk.f32.gmra.mxu3 %vm135_vm9, %v689_v19  ;;  %v1737_v19 = vld [vmem:[%s1899_s5 + $0x8] sm:$0xff] }
 0x978   :  { %794 = vmatpush.msra.mxu1 %v1737_v19 }
 0x97a   :  { %795 = vmatpush.msra.mxu1 %v1744_v20 }
 0x9f2   :  { %v431_v22 = vpop.f32.mrf.mxu2 }
 0x9f3   :  { %v434_v24 = vadd.f32 %v431_v22, %v111_v21 }
 0x9f5   :  { %v1336_v25 = vmul.f32 -1.442695, %v434_v24 }
 0x9f7   :  { %1406 = vpow2.f32 %v1336_v25 }
 0x9fd   :  { %v1407_v26 = vpop.eup %1406 }
 0x9fe   :  { %v439_v27 = vadd.f32 1.0, %v1407_v26 }
 0xa00   :  { %1408 = vrcp.f32 %v439_v27  ;;  %v451_v4 = vand.u32 2147483648, %v439_v27  ;;  %v449_v5 = vand.u32 2147483647, %v439_v27  ;;  %vm445_vm10 = vweird.f32 %v439_v27 }
 0xa01   :  { %1410 = vtanh.f32 %v434_v24  ;;  %v116_v24 = vpop.f32.mrf.mxu0 }
 0xa02   :  { %v452_v31 = vor.u32 1.1754944e-38, %v451_v4  ;;  %vm450_vm12 = vcmp.eq.f32.partialorder %v449_v5, 8.507059e+37  ;;  %v117_v25 = vadd.f32 %v1608_v7, %v116_v24 }
 0xa06   :  { %v1409_v0 = vpop.eup %1408 }
 0xa07   :  { %v441_v28 = vmul.f32 %v1409_v0, %v439_v27  ;;  %vm446_vm8 = vweird.f32 %v1409_v0  ;;  %v1411_v33 = vpop.eup %1410 }
 0xa08   :  { %vm447_vm11 = vmor %vm445_vm10, %vm446_vm8 }
 0xa09   :  { %v442_v1 = vsub.f32 1.0, %v441_v28 }
 0xa0b   :  { %v443_v29 = vmul.f32 %v1409_v0, %v442_v1 }
 0xa0d   :  { %v444_v30 = vadd.f32 %v1409_v0, %v443_v29 }
 0xa0f   :  { %v448_v32 = vsel %vm447_vm11, %v1409_v0, %v444_v30  ;;  %v1766_v0 = vld [vmem:[%s1898_s6] ss:$0 sm:$0xff] }
 0xa10   :  { %v453_v34 = vsel %vm450_vm12, %v452_v31, %v448_v32 }
 0xa11   :  { %v455_v35 = vsel %vm1611_vm5, %v1411_v33, %v453_v34 }
 0xa12   :  { %458 = vrot.lane.b32.xlu1 %v455_v35, %s1504_s21  ;;  %v456_v38 = vmul.f32 %v455_v35, %v397_v13 }
 0xa84   :  { %v459_v36 = vpop.permute.xlu1 %458 }
 0xa85   :  { %v461_v37 = vmul.f32 %v459_v36, %v455_v35 }
 0xa87   :  { %463 = vrot.lane.b32.xlu2 %v461_v37, %s1505_s22 }
 0xae1   :  { %v464_v39 = vpop.permute.xlu2 %463 }
 0xae2   :  { %v466_v40 = vadd.f32 %v464_v39, %v456_v38 }
 0xae4   :  { %1412 = vtanh.f32 %v466_v40 }
 0xaea   :  { %v1413_v41 = vpop.eup %1412 }
 0xaeb   :  { %469 = vrot.lane.b32.xlu0 %v1413_v41, %s1504_s21 }
 0xb5d   :  { %v470_v42 = vpop.permute.xlu0 %469 }
 0xb5e   :  { %v472_v43 = vmul.f32 %v470_v42, %v455_v35 }
 0xb60   :  { %474 = vrot.lane.b32.xlu1 %v472_v43, %s1505_s22 }
 0xbd2   :  { %v475_v45 = vpop.permute.xlu1 %474 }
 0xbd3   :  { %478 = vst.msk [vmem:[#allocation3 + $0x20] sm:$0xff] %vm135_vm9, %v475_v45  ;;  %1337 = vmatmul.msk.f32.vlgmr.msra.gmra.mxu2 %vm135_vm9, %v475_v45 }
 0xbd4   :  { %857 = vmatpush.msra.mxu2 %v1725_v17 }
 0xbd6   :  { %858 = vmatpush.msra.mxu2 %v1730_v18 }
 0xbd8   :  { %859 = vmatpush.msra.mxu2 %v1737_v19 }
 0xbda   :  { %v690_v46 = vld [vmem:[#allocation3 + $0x20] sm:$0xff]  ;;  %860 = vmatpush.msra.mxu2 %v1744_v20 }
 0xbdb   :  { %1347 = vmatmul.msk.f32.gmra.mxu3 %vm135_vm9, %v690_v46 }
 0xc56   :  { %v500_v49 = vpop.f32.mrf.mxu2 }
 0xc57   :  { %v503_v50 = vadd.f32 %v500_v49, %v114_v48 }
 0xc59   :  { %v1338_v51 = vmul.f32 -1.442695, %v503_v50 }
 0xc5b   :  { %1414 = vpow2.f32 %v1338_v51 }
 0xc61   :  { %v1415_v52 = vpop.eup %1414 }
 0xc62   :  { %v508_v53 = vadd.f32 1.0, %v1415_v52 }
 0xc64   :  { %1416 = vrcp.f32 %v508_v53  ;;  %v520_v57 = vand.u32 2147483648, %v508_v53  ;;  %v518_v59 = vand.u32 2147483647, %v508_v53  ;;  %vm514_vm14 = vweird.f32 %v508_v53 }
 0xc65   :  { %1418 = vtanh.f32 %v503_v50 }
 0xc66   :  { %v521_v61 = vor.u32 1.1754944e-38, %v520_v57  ;;  %vm519_vm0 = vcmp.eq.f32.partialorder %v518_v59, 8.507059e+37 }
 0xc6a   :  { %v1417_v54 = vpop.eup %1416 }
 0xc6b   :  { %v510_v55 = vmul.f32 %v1417_v54, %v508_v53  ;;  %vm515_vm13 = vweird.f32 %v1417_v54  ;;  %v1419_v63 = vpop.eup %1418 }
 0xc6c   :  { %vm516_vm15 = vmor %vm514_vm14, %vm515_vm13 }
 0xc6d   :  { %v511_v56 = vsub.f32 1.0, %v510_v55 }
 0xc6f   :  { %v512_v58 = vmul.f32 %v1417_v54, %v511_v56 }
 0xc71   :  { %v513_v60 = vadd.f32 %v1417_v54, %v512_v58 }
 0xc73   :  { %v517_v62 = vsel %vm516_vm15, %v1417_v54, %v513_v60 }
 0xc74   :  { %v522_v2 = vsel %vm519_vm0, %v521_v61, %v517_v62 }
 0xc75   :  { %v524_v3 = vsel %vm1611_vm5, %v1419_v63, %v522_v2 }
 0xc76   :  { %527 = vrot.lane.b32.xlu2 %v524_v3, %s1504_s21  ;;  %v525_v10 = vmul.f32 %v524_v3, %v466_v40 }
 0xcd0   :  { %v528_v8 = vpop.permute.xlu2 %527 }
 0xcd1   :  { %v530_v9 = vmul.f32 %v528_v8, %v524_v3 }
 0xcd3   :  { %532 = vrot.lane.b32.xlu0 %v530_v9, %s1505_s22 }
 0xd45   :  { %v533_v11 = vpop.permute.xlu0 %532 }
 0xd46   :  { %v1713_v12 = vadd.f32 %v533_v11, %v525_v10 }
 0xd48   :  { %1420 = vtanh.f32 %v1713_v12 }
 0xd4e   :  { %v1421_v13 = vpop.eup %1420 }
 0xd4f   :  { %538 = vrot.lane.b32.xlu1 %v1421_v13, %s1504_s21 }
 0xdc1   :  { %v539_v15 = vpop.permute.xlu1 %538 }
 0xdc2   :  { %v541_v16 = vmul.f32 %v539_v15, %v524_v3  ;;  %v46_v15 = vld [vmem:[%s1895_s0 + $0x38] sm:$0xff] }
 0xdc3   :  { %1327 = vmatmul.msk.f32.gmra.mxu0 %vm52_vm1, %v46_v15 }
 0xdc4   :  { %543 = vrot.lane.b32.xlu2 %v541_v16, %s1505_s22 }
 0xe1e   :  { %v544_v21 = vpop.permute.xlu2 %543 }
 0xe1f   :  { %547 = vst.msk [vmem:[#allocation3 + $0x28] sm:$0xff] %vm135_vm9, %v544_v21  ;;  %1339 = vmatmul.msk.f32.vlgmr.msrb.gmra.mxu1 %vm135_vm9, %v544_v21 }
 0xe20   :  { %922 = vmatpush.msrb.mxu1 %v1725_v17 }
 0xe22   :  { %923 = vmatpush.msrb.mxu1 %v1730_v18 }
 0xe24   :  { %924 = vmatpush.msrb.mxu1 %v1737_v19 }
 0xe26   :  { %v691_v22 = vld [vmem:[#allocation3 + $0x28] sm:$0xff]  ;;  %925 = vmatpush.msrb.mxu1 %v1744_v20 }
 0xe27   :  { %1348 = vmatmul.msk.f32.gmra.mxu3 %vm135_vm9, %v691_v22  ;;  %796 = vmatmul.f32.vlgmr.msra.gmra.mxu1 %v1503_v6  ;;  %v743_v6 = vpop.f32.mrf.mxu3 }
 0xe28   :  { %1052 = vmatpush.msra.mxu1 %v1725_v17  ;;  %v744_v1 = vadd.f32 %v1766_v0, %v743_v6 }
 0xe2a   :  { %1053 = vmatpush.msra.mxu1 %v1730_v18 }
 0xe2c   :  { %1054 = vmatpush.msra.mxu1 %v1737_v19 }
 0xe2e   :  { %1055 = vmatpush.msra.mxu1 %v1744_v20 }
 0xe9c   :  { %v569_v26 = vpop.f32.mrf.mxu1 }
 0xe9d   :  { %v572_v27 = vadd.f32 %v569_v26, %v117_v25  ;;  %v746_v25 = vpop.f32.mrf.mxu3 }
 0xe9e   :  { %v747_v26 = vadd.f32 %v1766_v0, %v746_v25 }
 0xe9f   :  { %v1340_v28 = vmul.f32 -1.442695, %v572_v27 }
 0xea1   :  { %1422 = vpow2.f32 %v1340_v28 }
 0xea4   :  { %v797_v4 = vpop.f32.mrf.mxu1 }
 0xea5   :  { %v800_v29 = vadd.f32 %v797_v4, %v744_v1 }
 0xea7   :  { %v1423_v5 = vpop.eup %1422  ;;  %v1351_v30 = vmul.f32 -1.442695, %v800_v29 }
 0xea8   :  { %v577_v31 = vadd.f32 1.0, %v1423_v5 }
 0xea9   :  { %1424 = vpow2.f32 %v1351_v30 }
 0xeaa   :  { %1426 = vrcp.f32 %v577_v31  ;;  %v589_v36 = vand.u32 2147483648, %v577_v31  ;;  %v587_v38 = vand.u32 2147483647, %v577_v31  ;;  %vm583_vm3 = vweird.f32 %v577_v31 }
 0xeac   :  { %v590_v41 = vor.u32 1.1754944e-38, %v589_v36  ;;  %vm588_vm6 = vcmp.eq.f32.partialorder %v587_v38, 8.507059e+37 }
 0xeaf   :  { %v1425_v7 = vpop.eup %1424 }
 0xeb0   :  { %v1427_v32 = vpop.eup %1426  ;;  %v805_v33 = vadd.f32 1.0, %v1425_v7 }
 0xeb1   :  { %v579_v34 = vmul.f32 %v1427_v32, %v577_v31  ;;  %vm584_vm2 = vweird.f32 %v1427_v32 }
 0xeb2   :  { %1428 = vrcp.f32 %v805_v33  ;;  %vm585_vm4 = vmor %vm583_vm3, %vm584_vm2  ;;  %v817_v48 = vand.u32 2147483648, %v805_v33  ;;  %v815_v50 = vand.u32 2147483647, %v805_v33  ;;  %vm811_vm8 = vweird.f32 %v805_v33 }
 0xeb3   :  { %v580_v35 = vsub.f32 1.0, %v579_v34  ;;  %1430 = vtanh.f32 %v572_v27 }
 0xeb4   :  { %1432 = vtanh.f32 %v800_v29  ;;  %v818_v52 = vor.u32 1.1754944e-38, %v817_v48  ;;  %vm816_vm11 = vcmp.eq.f32.partialorder %v815_v50, 8.507059e+37  ;;  %v749_v48 = vpop.f32.mrf.mxu3 }
 0xeb5   :  { %v581_v37 = vmul.f32 %v1427_v32, %v580_v35 }
 0xeb7   :  { %v582_v39 = vadd.f32 %v1427_v32, %v581_v37 }
 0xeb8   :  { %v1429_v40 = vpop.eup %1428 }
 0xeb9   :  { %v586_v42 = vsel %vm585_vm4, %v1427_v32, %v582_v39  ;;  %v807_v43 = vmul.f32 %v1429_v40, %v805_v33  ;;  %v1431_v44 = vpop.eup %1430  ;;  %vm812_vm7 = vweird.f32 %v1429_v40 }
 0xeba   :  { %v591_v45 = vsel %vm588_vm6, %v590_v41, %v586_v42  ;;  %vm813_vm10 = vmor %vm811_vm8, %vm812_vm7  ;;  %v1433_v54 = vpop.eup %1432 }
 0xebb   :  { %v593_v46 = vsel %vm1611_vm5, %v1431_v44, %v591_v45  ;;  %v808_v47 = vsub.f32 1.0, %v807_v43 }
 0xebc   :  { %596 = vrot.lane.b32.xlu0 %v593_v46, %s1504_s21  ;;  %v594_v61 = vmul.f32 %v593_v46, %v1713_v12  ;;  %v752_v25 = vpop.f32.mrf.mxu3 }
 0xebd   :  { %v809_v49 = vmul.f32 %v1429_v40, %v808_v47 }
 0xebf   :  { %v810_v51 = vadd.f32 %v1429_v40, %v809_v49  ;;  %v750_v49 = vadd.f32 %v1766_v0, %v749_v48 }
 0xec1   :  { %v814_v53 = vsel %vm813_vm10, %v1429_v40, %v810_v51 }
 0xec2   :  { %v819_v55 = vsel %vm816_vm11, %v818_v52, %v814_v53 }
 0xec3   :  { %v821_v56 = vsel %vm1611_vm5, %v1433_v54, %v819_v55 }
 0xec4   :  { %824 = vrot.lane.b32.xlu1 %v821_v56, %s1504_s21  ;;  %v822_v3 = vmul.f32 0.0, %v821_v56 }
 0xf2e   :  { %v597_v57 = vpop.permute.xlu0 %596 }
 0xf2f   :  { %v599_v58 = vmul.f32 %v597_v57, %v593_v46 }
 0xf31   :  { %601 = vrot.lane.b32.xlu2 %v599_v58, %s1505_s22 }
 0xf36   :  { %v825_v59 = vpop.permute.xlu1 %824 }
 0xf37   :  { %v827_v60 = vmul.f32 %v825_v59, %v821_v56 }
 0xf39   :  { %829 = vrot.lane.b32.xlu0 %v827_v60, %s1505_s22 }
 0xf8b   :  { %v602_v62 = vpop.permute.xlu2 %601 }
 0xf8c   :  { %v1778_v63 = vadd.f32 %v602_v62, %v594_v61 }
 0xf8e   :  { %1434 = vtanh.f32 %v1778_v63 }
 0xf94   :  { %v1435_v2 = vpop.eup %1434 }
 0xf95   :  { %607 = vrot.lane.b32.xlu1 %v1435_v2, %s1504_s21 }
 0xfab   :  { %v830_v8 = vpop.permute.xlu0 %829 }
 0xfac   :  { %v832_v9 = vadd.f32 %v830_v8, %v822_v3 }
 0xfae   :  { %1436 = vtanh.f32 %v832_v9 }
 0xfb4   :  { %v1437_v10 = vpop.eup %1436 }
 0xfb5   :  { %835 = vrot.lane.b32.xlu2 %v1437_v10, %s1504_s21 }
0x1007   :  { %v608_v11 = vpop.permute.xlu1 %607 }
0x1008   :  { %v610_v13 = vmul.f32 %v608_v11, %v593_v46 }
0x100a   :  { %612 = vrot.lane.b32.xlu0 %v610_v13, %s1505_s22 }
0x100f   :  { %v836_v12 = vpop.permute.xlu2 %835 }
0x1010   :  { %v838_v14 = vmul.f32 %v836_v12, %v821_v56 }
0x1012   :  { %841 = vrot.lane.b32.xlu1 %v838_v14, %s1505_s22 }
0x107c   :  { %v613_v16 = vpop.permute.xlu0 %612 }
0x107d   :  { %616 = vst.msk [vmem:[#allocation3 + $0x30] sm:$0xff] %vm135_vm9, %v613_v16  ;;  %1341 = vmatmul.msk.f32.vlgmr.msrb.gmra.mxu2 %vm135_vm9, %v613_v16 }
0x107e   :  { %987 = vmatpush.msrb.mxu2 %v1725_v17 }
0x1080   :  { %988 = vmatpush.msrb.mxu2 %v1730_v18 }
0x1082   :  { %989 = vmatpush.msrb.mxu2 %v1737_v19 }
0x1084   :  { %v842_v21 = vpop.permute.xlu1 %841  ;;  %v692_v22 = vld [vmem:[#allocation3 + $0x30] sm:$0xff]  ;;  %990 = vmatpush.msrb.mxu2 %v1744_v20 }
0x1085   :  { %1349 = vmatmul.msk.f32.gmra.mxu3 %vm135_vm9, %v692_v22  ;;  %1352 = vmatmul.msk.f32.vlgmr.msra.gmra.mxu2 %vm135_vm9, %v842_v21 }
0x1086   :  { %1117 = vmatpush.msra.mxu2 %v1725_v17 }
0x1088   :  { %1118 = vmatpush.msra.mxu2 %v1730_v18 }
0x108a   :  { %1119 = vmatpush.msra.mxu2 %v1737_v19 }
0x108c   :  { %1120 = vmatpush.msra.mxu2 %v1744_v20 }
0x1100   :  { %v1801_v24 = vpop.f32.mrf.mxu2 }
0x1108   :  { %v862_v27 = vpop.f32.mrf.mxu2 }
0x1109   :  { %v865_v28 = vadd.f32 %v862_v27, %v747_v26  ;;  %v753_v26 = vadd.f32 %v1766_v0, %v752_v25 }
0x110b   :  { %v1353_v6 = vmul.f32 -1.442695, %v865_v28 }
0x110d   :  { %1438 = vpow2.f32 %v1353_v6 }
0x1113   :  { %v1439_v1 = vpop.eup %1438 }
0x1114   :  { %v870_v4 = vadd.f32 1.0, %v1439_v1 }
0x1116   :  { %1440 = vrcp.f32 %v870_v4  ;;  %v882_v31 = vand.u32 2147483648, %v870_v4  ;;  %v880_v32 = vand.u32 2147483647, %v870_v4  ;;  %vm876_vm12 = vweird.f32 %v870_v4 }
0x1117   :  { %1442 = vtanh.f32 %v865_v28 }
0x1118   :  { %v883_v34 = vor.u32 1.1754944e-38, %v882_v31  ;;  %vm881_vm14 = vcmp.eq.f32.partialorder %v880_v32, 8.507059e+37 }
0x111c   :  { %v1441_v29 = vpop.eup %1440 }
0x111d   :  { %v872_v5 = vmul.f32 %v1441_v29, %v870_v4  ;;  %vm877_vm1 = vweird.f32 %v1441_v29  ;;  %v1443_v36 = vpop.eup %1442 }
0x111e   :  { %vm878_vm13 = vmor %vm876_vm12, %vm877_vm1 }
0x111f   :  { %v873_v30 = vsub.f32 1.0, %v872_v5 }
0x1121   :  { %v874_v7 = vmul.f32 %v1441_v29, %v873_v30 }
0x1123   :  { %v875_v33 = vadd.f32 %v1441_v29, %v874_v7 }
0x1125   :  { %v879_v35 = vsel %vm878_vm13, %v1441_v29, %v875_v33 }
0x1126   :  { %v884_v37 = vsel %vm881_vm14, %v883_v34, %v879_v35 }
0x1127   :  { %v886_v38 = vsel %vm1611_vm5, %v1443_v36, %v884_v37 }
0x1128   :  { %889 = vrot.lane.b32.xlu2 %v886_v38, %s1504_s21  ;;  %v887_v41 = vmul.f32 %v886_v38, %v832_v9 }
0x1182   :  { %v890_v39 = vpop.permute.xlu2 %889 }
0x1183   :  { %v892_v40 = vmul.f32 %v890_v39, %v886_v38 }
0x1185   :  { %894 = vrot.lane.b32.xlu0 %v892_v40, %s1505_s22 }
0x11f7   :  { %v895_v42 = vpop.permute.xlu0 %894 }
0x11f8   :  { %v897_v43 = vadd.f32 %v895_v42, %v887_v41 }
0x11fa   :  { %1444 = vtanh.f32 %v897_v43 }
0x1200   :  { %v1445_v44 = vpop.eup %1444 }
0x1201   :  { %900 = vrot.lane.b32.xlu1 %v1445_v44, %s1504_s21  ;;  %v755_v44 = vpop.f32.mrf.mxu3 }
0x1273   :  { %v901_v45 = vpop.permute.xlu1 %900 }
0x1274   :  { %v903_v46 = vmul.f32 %v901_v45, %v886_v38  ;;  %v756_v45 = vadd.f32 %v1766_v0, %v755_v44 }
0x1276   :  { %906 = vrot.lane.b32.xlu2 %v903_v46, %s1505_s22 }
0x12d0   :  { %v907_v47 = vpop.permute.xlu2 %906 }
0x12d1   :  { %1354 = vmatmul.msk.f32.vlgmr.msrb.gmra.mxu1 %vm135_vm9, %v907_v47 }
0x12d2   :  { %1182 = vmatpush.msrb.mxu1 %v1725_v17 }
0x12d4   :  { %1183 = vmatpush.msrb.mxu1 %v1730_v18 }
0x12d6   :  { %1184 = vmatpush.msrb.mxu1 %v1737_v19 }
0x12d8   :  { %1185 = vmatpush.msrb.mxu1 %v1744_v20 }
0x134e   :  { %v927_v50 = vpop.f32.mrf.mxu1 }
0x134f   :  { %v930_v51 = vadd.f32 %v927_v50, %v750_v49 }
0x1351   :  { %v1355_v52 = vmul.f32 -1.442695, %v930_v51 }
0x1353   :  { %1446 = vpow2.f32 %v1355_v52 }
0x1359   :  { %v1447_v53 = vpop.eup %1446 }
0x135a   :  { %v935_v54 = vadd.f32 1.0, %v1447_v53 }
0x135c   :  { %1448 = vrcp.f32 %v935_v54  ;;  %v947_v58 = vand.u32 2147483648, %v935_v54  ;;  %v945_v60 = vand.u32 2147483647, %v935_v54  ;;  %vm941_vm0 = vweird.f32 %v935_v54 }
0x135d   :  { %1450 = vtanh.f32 %v930_v51 }
0x135e   :  { %v948_v62 = vor.u32 1.1754944e-38, %v947_v58  ;;  %vm946_vm3 = vcmp.eq.f32.partialorder %v945_v60, 8.507059e+37 }
0x1362   :  { %v1449_v55 = vpop.eup %1448 }
0x1363   :  { %v937_v56 = vmul.f32 %v1449_v55, %v935_v54  ;;  %vm942_vm15 = vweird.f32 %v1449_v55  ;;  %v1451_v3 = vpop.eup %1450 }
0x1364   :  { %vm943_vm2 = vmor %vm941_vm0, %vm942_vm15 }
0x1365   :  { %v938_v57 = vsub.f32 1.0, %v937_v56 }
0x1367   :  { %v939_v59 = vmul.f32 %v1449_v55, %v938_v57 }
0x1369   :  { %v940_v61 = vadd.f32 %v1449_v55, %v939_v59 }
0x136b   :  { %v944_v2 = vsel %vm943_vm2, %v1449_v55, %v940_v61 }
0x136c   :  { %v949_v8 = vsel %vm946_vm3, %v948_v62, %v944_v2 }
0x136d   :  { %v951_v9 = vsel %vm1611_vm5, %v1451_v3, %v949_v8 }
0x136e   :  { %954 = vrot.lane.b32.xlu0 %v951_v9, %s1504_s21  ;;  %v952_v13 = vmul.f32 %v951_v9, %v897_v43 }
0x13e0   :  { %v955_v10 = vpop.permute.xlu0 %954 }
0x13e1   :  { %v957_v11 = vmul.f32 %v955_v10, %v951_v9 }
0x13e3   :  { %959 = vrot.lane.b32.xlu1 %v957_v11, %s1505_s22 }
0x1455   :  { %v960_v12 = vpop.permute.xlu1 %959 }
0x1456   :  { %v962_v14 = vadd.f32 %v960_v12, %v952_v13 }
0x1458   :  { %1452 = vtanh.f32 %v962_v14 }
0x145e   :  { %v1453_v15 = vpop.eup %1452 }
0x145f   :  { %965 = vrot.lane.b32.xlu2 %v1453_v15, %s1504_s21  ;;  %v758_v15 = vpop.f32.mrf.mxu3 }
0x14b9   :  { %v966_v16 = vpop.permute.xlu2 %965 }
0x14ba   :  { %v968_v21 = vmul.f32 %v966_v16, %v951_v9  ;;  %v759_v16 = vadd.f32 %v1766_v0, %v758_v15 }
0x14bc   :  { %971 = vrot.lane.b32.xlu0 %v968_v21, %s1505_s22 }
0x152e   :  { %v972_v22 = vpop.permute.xlu0 %971 }
0x152f   :  { %1356 = vmatmul.msk.f32.vlgmr.msrb.gmra.mxu2 %vm135_vm9, %v972_v22 }
0x1530   :  { %1247 = vmatpush.msrb.mxu2 %v1725_v17 }
0x1532   :  { %1248 = vmatpush.msrb.mxu2 %v1730_v18 }
0x1534   :  { %1249 = vmatpush.msrb.mxu2 %v1737_v19 }
0x1536   :  { %1250 = vmatpush.msrb.mxu2 %v1744_v20 }
0x15b2   :  { %v992_v27 = vpop.f32.mrf.mxu2 }
0x15b3   :  { %v995_v28 = vadd.f32 %v992_v27, %v753_v26 }
0x15b5   :  { %v1357_v6 = vmul.f32 -1.442695, %v995_v28 }
0x15b7   :  { %1454 = vpow2.f32 %v1357_v6 }
0x15bd   :  { %v1455_v1 = vpop.eup %1454 }
0x15be   :  { %v1000_v4 = vadd.f32 1.0, %v1455_v1 }
0x15c0   :  { %1456 = vrcp.f32 %v1000_v4  ;;  %v1012_v17 = vand.u32 2147483648, %v1000_v4  ;;  %v1010_v19 = vand.u32 2147483647, %v1000_v4  ;;  %vm1006_vm6 = vweird.f32 %v1000_v4 }
0x15c1   :  { %1458 = vtanh.f32 %v995_v28 }
0x15c2   :  { %v1013_v20 = vor.u32 1.1754944e-38, %v1012_v17  ;;  %vm1011_vm8 = vcmp.eq.f32.partialorder %v1010_v19, 8.507059e+37 }
0x15c6   :  { %v1457_v29 = vpop.eup %1456 }
0x15c7   :  { %v1002_v5 = vmul.f32 %v1457_v29, %v1000_v4  ;;  %vm1007_vm4 = vweird.f32 %v1457_v29  ;;  %v1459_v32 = vpop.eup %1458 }
0x15c8   :  { %vm1008_vm7 = vmor %vm1006_vm6, %vm1007_vm4 }
0x15c9   :  { %v1003_v30 = vsub.f32 1.0, %v1002_v5 }
0x15cb   :  { %v1004_v18 = vmul.f32 %v1457_v29, %v1003_v30 }
0x15cd   :  { %v1005_v31 = vadd.f32 %v1457_v29, %v1004_v18 }
0x15cf   :  { %v1009_v7 = vsel %vm1008_vm7, %v1457_v29, %v1005_v31 }
0x15d0   :  { %v1014_v33 = vsel %vm1011_vm8, %v1013_v20, %v1009_v7  ;;  %v119_v7 = vpop.f32.mrf.mxu0 }
0x15d1   :  { %v1016_v34 = vsel %vm1611_vm5, %v1459_v32, %v1014_v33  ;;  %v1502_v32 = vld [vmem:[%s1896_s3] ss:$0 sm:$0xff] }
0x15d2   :  { %1019 = vrot.lane.b32.xlu1 %v1016_v34, %s1504_s21  ;;  %v1017_v37 = vmul.f32 %v1016_v34, %v962_v14  ;;  %v120_v33 = vadd.f32 %v1502_v32, %v119_v7 }
0x1644   :  { %v1020_v35 = vpop.permute.xlu1 %1019 }
0x1645   :  { %v1022_v36 = vmul.f32 %v1020_v35, %v1016_v34 }
0x1647   :  { %1024 = vrot.lane.b32.xlu2 %v1022_v36, %s1505_s22 }
0x16a1   :  { %v1025_v38 = vpop.permute.xlu2 %1024 }
0x16a2   :  { %v1027_v39 = vadd.f32 %v1025_v38, %v1017_v37 }
0x16a4   :  { %1460 = vtanh.f32 %v1027_v39 }
0x16aa   :  { %v1461_v40 = vpop.eup %1460 }
0x16ab   :  { %1030 = vrot.lane.b32.xlu0 %v1461_v40, %s1504_s21 }
0x171d   :  { %v1031_v41 = vpop.permute.xlu0 %1030 }
0x171e   :  { %v1033_v42 = vmul.f32 %v1031_v41, %v1016_v34  ;;  %v641_v34 = vadd.f32 %v1801_v24, %v120_v33 }
0x1720   :  { %1036 = vrot.lane.b32.xlu1 %v1033_v42, %s1505_s22  ;;  %v1342_v35 = vmul.f32 -1.442695, %v641_v34 }
0x1792   :  { %v1037_v43 = vpop.permute.xlu1 %1036 }
0x1793   :  { %1358 = vmatmul.msk.f32.vlgmr.msra.gmra.mxu1 %vm135_vm9, %v1037_v43 }
0x1810   :  { %v1057_v46 = vpop.f32.mrf.mxu1 }
0x1811   :  { %v1060_v47 = vadd.f32 %v1057_v46, %v756_v45 }
0x1813   :  { %v1359_v48 = vmul.f32 -1.442695, %v1060_v47 }
0x1815   :  { %1462 = vpow2.f32 %v1359_v48 }
0x181b   :  { %v1463_v49 = vpop.eup %1462 }
0x181c   :  { %v1065_v50 = vadd.f32 1.0, %v1463_v49 }
0x181e   :  { %1464 = vrcp.f32 %v1065_v50  ;;  %v1077_v54 = vand.u32 2147483648, %v1065_v50  ;;  %v1075_v56 = vand.u32 2147483647, %v1065_v50  ;;  %vm1071_vm11 = vweird.f32 %v1065_v50 }
0x181f   :  { %1466 = vtanh.f32 %v1060_v47 }
0x1820   :  { %v1078_v58 = vor.u32 1.1754944e-38, %v1077_v54  ;;  %vm1076_vm12 = vcmp.eq.f32.partialorder %v1075_v56, 8.507059e+37 }
0x1824   :  { %v1465_v51 = vpop.eup %1464 }
0x1825   :  { %v1067_v52 = vmul.f32 %v1465_v51, %v1065_v50  ;;  %vm1072_vm10 = vweird.f32 %v1465_v51  ;;  %v1467_v60 = vpop.eup %1466 }
0x1826   :  { %vm1073_vm1 = vmor %vm1071_vm11, %vm1072_vm10 }
0x1827   :  { %v1068_v53 = vsub.f32 1.0, %v1067_v52 }
0x1829   :  { %v1069_v55 = vmul.f32 %v1465_v51, %v1068_v53 }
0x182b   :  { %v1070_v57 = vadd.f32 %v1465_v51, %v1069_v55 }
0x182d   :  { %v1074_v59 = vsel %vm1073_vm1, %v1465_v51, %v1070_v57 }
0x182e   :  { %v1079_v61 = vsel %vm1076_vm12, %v1078_v58, %v1074_v59 }
0x182f   :  { %v1081_v62 = vsel %vm1611_vm5, %v1467_v60, %v1079_v61  ;;  %v761_v60 = vpop.f32.mrf.mxu3 }
0x1830   :  { %1084 = vrot.lane.b32.xlu2 %v1081_v62, %s1504_s21  ;;  %v1082_v8 = vmul.f32 %v1081_v62, %v1027_v39  ;;  %v762_v61 = vadd.f32 %v1766_v0, %v761_v60 }
0x188a   :  { %v1085_v2 = vpop.permute.xlu2 %1084 }
0x188b   :  { %v1087_v3 = vmul.f32 %v1085_v2, %v1081_v62 }
0x188d   :  { %1089 = vrot.lane.b32.xlu0 %v1087_v3, %s1505_s22 }
0x18ff   :  { %v1090_v9 = vpop.permute.xlu0 %1089 }
0x1900   :  { %v1840_v10 = vadd.f32 %v1090_v9, %v1082_v8 }
0x1902   :  { %1468 = vtanh.f32 %v1840_v10 }
0x1908   :  { %v1469_v11 = vpop.eup %1468 }
0x1909   :  { %1095 = vrot.lane.b32.xlu1 %v1469_v11, %s1504_s21 }
0x197b   :  { %v1096_v13 = vpop.permute.xlu1 %1095 }
0x197c   :  { %v1098_v12 = vmul.f32 %v1096_v13, %v1081_v62 }
0x197e   :  { %1101 = vrot.lane.b32.xlu2 %v1098_v12, %s1505_s22 }
0x19d8   :  { %v1102_v14 = vpop.permute.xlu2 %1101 }
0x19d9   :  { %1360 = vmatmul.msk.f32.vlgmr.msra.gmra.mxu2 %vm135_vm9, %v1102_v14 }
0x1a5c   :  { %v1122_v21 = vpop.f32.mrf.mxu2 }
0x1a5d   :  { %v1125_v22 = vadd.f32 %v1122_v21, %v759_v16 }
0x1a5f   :  { %v1361_v25 = vmul.f32 -1.442695, %v1125_v22 }
0x1a61   :  { %1470 = vpow2.f32 %v1361_v25 }
0x1a67   :  { %v1471_v26 = vpop.eup %1470 }
0x1a68   :  { %v1130_v27 = vadd.f32 1.0, %v1471_v26 }
0x1a6a   :  { %1472 = vrcp.f32 %v1130_v27  ;;  %v1142_v4 = vand.u32 2147483648, %v1130_v27  ;;  %v1140_v5 = vand.u32 2147483647, %v1130_v27  ;;  %vm1136_vm14 = vweird.f32 %v1130_v27 }
0x1a6b   :  { %1474 = vtanh.f32 %v1125_v22 }
0x1a6c   :  { %v1143_v17 = vor.u32 1.1754944e-38, %v1142_v4  ;;  %vm1141_vm0 = vcmp.eq.f32.partialorder %v1140_v5, 8.507059e+37  ;;  %1476 = vpow2.f32 %v1342_v35 }
0x1a70   :  { %v1473_v28 = vpop.eup %1472 }
0x1a71   :  { %v1132_v6 = vmul.f32 %v1473_v28, %v1130_v27  ;;  %vm1137_vm13 = vweird.f32 %v1473_v28  ;;  %v1475_v19 = vpop.eup %1474 }
0x1a72   :  { %vm1138_vm15 = vmor %vm1136_vm14, %vm1137_vm13  ;;  %v1477_v36 = vpop.eup %1476 }
0x1a73   :  { %v1133_v1 = vsub.f32 1.0, %v1132_v6  ;;  %v646_v37 = vadd.f32 1.0, %v1477_v36 }
0x1a75   :  { %v1134_v29 = vmul.f32 %v1473_v28, %v1133_v1  ;;  %1478 = vrcp.f32 %v646_v37  ;;  %v658_v45 = vand.u32 2147483648, %v646_v37  ;;  %vm652_vm3 = vweird.f32 %v646_v37 }
0x1a76   :  { %v656_v46 = vand.u32 2147483647, %v646_v37  ;;  %1480 = vtanh.f32 %v641_v34 }
0x1a77   :  { %v1135_v30 = vadd.f32 %v1473_v28, %v1134_v29  ;;  %v659_v47 = vor.u32 1.1754944e-38, %v658_v45 }
0x1a78   :  { %vm657_vm6 = vcmp.eq.f32.partialorder %v656_v46, 8.507059e+37 }
0x1a79   :  { %v1139_v18 = vsel %vm1138_vm15, %v1473_v28, %v1135_v30 }
0x1a7a   :  { %v1144_v31 = vsel %vm1141_vm0, %v1143_v17, %v1139_v18 }
0x1a7b   :  { %v1146_v20 = vsel %vm1611_vm5, %v1475_v19, %v1144_v31  ;;  %v1479_v38 = vpop.eup %1478 }
0x1a7c   :  { %1149 = vrot.lane.b32.xlu0 %v1146_v20, %s1504_s21  ;;  %v648_v39 = vmul.f32 %v1479_v38, %v646_v37  ;;  %vm653_vm2 = vweird.f32 %v1479_v38  ;;  %v1481_v49 = vpop.eup %1480  ;;  %v1147_v51 = vmul.f32 %v1146_v20, %v1840_v10 }
0x1a7d   :  { %vm654_vm4 = vmor %vm652_vm3, %vm653_vm2 }
0x1a7e   :  { %v649_v40 = vsub.f32 1.0, %v648_v39 }
0x1a80   :  { %v650_v41 = vmul.f32 %v1479_v38, %v649_v40 }
0x1a82   :  { %v651_v43 = vadd.f32 %v1479_v38, %v650_v41 }
0x1a84   :  { %v655_v24 = vsel %vm654_vm4, %v1479_v38, %v651_v43 }
0x1a85   :  { %v660_v48 = vsel %vm657_vm6, %v659_v47, %v655_v24 }
0x1a86   :  { %v662_v50 = vsel %vm1611_vm5, %v1481_v49, %v660_v48 }
0x1a87   :  { %v663_v21 = vmul.f32 %v662_v50, %v1778_v63 }
0x1aee   :  { %v1150_v42 = vpop.permute.xlu0 %1149 }
0x1aef   :  { %v1152_v44 = vmul.f32 %v1150_v42, %v1146_v20 }
0x1af1   :  { %1154 = vrot.lane.b32.xlu1 %v1152_v44, %s1505_s22 }
0x1af9   :  { %665 = vrot.lane.b32.xlu1 %v662_v50, %s1504_s21 }
0x1b63   :  { %v1155_v52 = vpop.permute.xlu1 %1154 }
0x1b64   :  { %v1157_v53 = vadd.f32 %v1155_v52, %v1147_v51  ;;  %v1372_v52 = vld [vmem:[%s1900_s7] ss:$0 sm:$0xff] }
0x1b66   :  { %1482 = vtanh.f32 %v1157_v53 }
0x1b6b   :  { %v666_v57 = vpop.permute.xlu1 %665 }
0x1b6c   :  { %v1483_v54 = vpop.eup %1482  ;;  %v668_v58 = vmul.f32 %v666_v57, %v662_v50 }
0x1b6d   :  { %1160 = vrot.lane.b32.xlu2 %v1483_v54, %s1504_s21 }
0x1bc7   :  { %v1161_v55 = vpop.permute.xlu2 %1160 }
0x1bc8   :  { %v1163_v56 = vmul.f32 %v1161_v55, %v1146_v20 }
0x1bca   :  { %1166 = vrot.lane.b32.xlu0 %v1163_v56, %s1505_s22 }
0x1bd2   :  { %670 = vrot.lane.b32.xlu0 %v668_v58, %s1505_s22 }
0x1c3c   :  { %v1167_v59 = vpop.permute.xlu0 %1166 }
0x1c3d   :  { %1362 = vmatmul.msk.f32.vlgmr.msrb.gmra.mxu1 %vm135_vm9, %v1167_v59 }
0x1c44   :  { %v671_v16 = vpop.permute.xlu0 %670 }
0x1c45   :  { %v673_v26 = vadd.f32 %v671_v16, %v663_v21 }
0x1cba   :  { %v1187_v62 = vpop.f32.mrf.mxu1 }
0x1cbb   :  { %v1190_v2 = vadd.f32 %v1187_v62, %v762_v61  ;;  %v14_v62 = vstv %s1901_s8 }
0x1cbc   :  { %15 = vst [vmem:[#allocation4] sm:$0x1] %v14_v62 }
0x1cbd   :  { %v1363_v3 = vmul.f32 -1.442695, %v1190_v2 }
0x1cbf   :  { %1484 = vpow2.f32 %v1363_v3 }
0x1cc5   :  { %v1485_v8 = vpop.eup %1484 }
0x1cc6   :  { %v1195_v9 = vadd.f32 1.0, %v1485_v8  ;;  %v1373_v8 = vld [vmem:[#allocation4] ss:$0 sm:$0xff] }
0x1cc8   :  { %1486 = vrcp.f32 %v1195_v9  ;;  %v1207_v12 = vand.u32 2147483648, %v1195_v9  ;;  %v1205_v15 = vand.u32 2147483647, %v1195_v9  ;;  %vm1201_vm8 = vweird.f32 %v1195_v9 }
0x1cc9   :  { %1488 = vtanh.f32 %v1190_v2 }
0x1cca   :  { %v1208_v25 = vor.u32 1.1754944e-38, %v1207_v12  ;;  %vm1206_vm11 = vcmp.eq.f32.partialorder %v1205_v15, 8.507059e+37  ;;  %1490 = vtanh.f32 %v673_v26 }
0x1cce   :  { %v1487_v10 = vpop.eup %1486 }
0x1ccf   :  { %v1197_v11 = vmul.f32 %v1487_v10, %v1195_v9  ;;  %vm1202_vm7 = vweird.f32 %v1487_v10  ;;  %v1489_v28 = vpop.eup %1488 }
0x1cd0   :  { %vm1203_vm10 = vmor %vm1201_vm8, %vm1202_vm7  ;;  %v1491_v4 = vpop.eup %1490 }
0x1cd1   :  { %v1198_v13 = vsub.f32 1.0, %v1197_v11 }
0x1cd3   :  { %v1199_v14 = vmul.f32 %v1487_v10, %v1198_v13 }
0x1cd5   :  { %v1200_v22 = vadd.f32 %v1487_v10, %v1199_v14 }
0x1cd7   :  { %v1204_v27 = vsel %vm1203_vm10, %v1487_v10, %v1200_v22 }
0x1cd8   :  { %v1209_v6 = vsel %vm1206_vm11, %v1208_v25, %v1204_v27 }
0x1cd9   :  { %v1211_v1 = vsel %vm1611_vm5, %v1489_v28, %v1209_v6 }
0x1cda   :  { %1214 = vrot.lane.b32.xlu2 %v1211_v1, %s1504_s21  ;;  %v1212_v17 = vmul.f32 %v1211_v1, %v1157_v53 }
0x1ce2   :  { %676 = vrot.lane.b32.xlu2 %v1491_v4, %s1504_s21 }
0x1d34   :  { %v1215_v29 = vpop.permute.xlu2 %1214 }
0x1d35   :  { %v1217_v63 = vmul.f32 %v1215_v29, %v1211_v1 }
0x1d37   :  { %1219 = vrot.lane.b32.xlu1 %v1217_v63, %s1505_s22 }
0x1d3c   :  { %v677_v5 = vpop.permute.xlu2 %676 }
0x1d3d   :  { %v679_v30 = vmul.f32 %v677_v5, %v662_v50 }
0x1d3f   :  { %681 = vrot.lane.b32.xlu1 %v679_v30, %s1505_s22 }
0x1da9   :  { %v1220_v18 = vpop.permute.xlu1 %1219 }
0x1daa   :  { %v1222_v19 = vadd.f32 %v1220_v18, %v1212_v17 }
0x1dac   :  { %1492 = vtanh.f32 %v1222_v19 }
0x1db1   :  { %v682_v31 = vpop.permute.xlu1 %681 }
0x1db2   :  { %v1493_v20 = vpop.eup %1492  ;;  %685 = vst.msk [vmem:[#allocation3 + $0x38] sm:$0xff] %vm135_vm9, %v682_v31 }
0x1db3   :  { %1225 = vrot.lane.b32.xlu0 %v1493_v20, %s1504_s21 }
0x1db9   :  { %v693_v7 = vld [vmem:[#allocation3 + $0x38] sm:$0xff] }
0x1dba   :  { %1350 = vmatmul.msk.f32.gmra.mxu3 %vm135_vm9, %v693_v7 }
0x1e25   :  { %v1226_v32 = vpop.permute.xlu0 %1225 }
0x1e26   :  { %v1228_v33 = vmul.f32 %v1226_v32, %v1211_v1 }
0x1e28   :  { %1231 = vrot.lane.b32.xlu2 %v1228_v33, %s1505_s22 }
0x1e3d   :  { %v764_v35 = vpop.f32.mrf.mxu3 }
0x1e3e   :  { %v765_v36 = vadd.f32 %v1766_v0, %v764_v35 }
0x1e82   :  { %v1232_v34 = vpop.permute.xlu2 %1231 }
0x1e83   :  { %1364 = vmatmul.msk.f32.vlgmr.msrb.gmra.mxu2 %vm135_vm9, %v1232_v34 }
0x1f06   :  { %v1252_v37 = vpop.f32.mrf.mxu2 }
0x1f07   :  { %v1255_v38 = vadd.f32 %v1252_v37, %v765_v36 }
0x1f09   :  { %v1365_v39 = vmul.f32 -1.442695, %v1255_v38 }
0x1f0b   :  { %1494 = vpow2.f32 %v1365_v39 }
0x1f11   :  { %v1495_v40 = vpop.eup %1494 }
0x1f12   :  { %v1260_v41 = vadd.f32 1.0, %v1495_v40 }
0x1f14   :  { %1496 = vrcp.f32 %v1260_v41  ;;  %v1272_v45 = vand.u32 2147483648, %v1260_v41  ;;  %v1270_v24 = vand.u32 2147483647, %v1260_v41  ;;  %vm1266_vm12 = vweird.f32 %v1260_v41 }
0x1f15   :  { %1498 = vtanh.f32 %v1255_v38 }
0x1f16   :  { %v1273_v48 = vor.u32 1.1754944e-38, %v1272_v45  ;;  %vm1271_vm14 = vcmp.eq.f32.partialorder %v1270_v24, 8.507059e+37 }
0x1f1a   :  { %v1497_v42 = vpop.eup %1496 }
0x1f1b   :  { %v1262_v43 = vmul.f32 %v1497_v42, %v1260_v41  ;;  %vm1267_vm1 = vweird.f32 %v1497_v42  ;;  %v1499_v49 = vpop.eup %1498 }
0x1f1c   :  { %vm1268_vm13 = vmor %vm1266_vm12, %vm1267_vm1 }
0x1f1d   :  { %v1263_v44 = vsub.f32 1.0, %v1262_v43 }
0x1f1f   :  { %v1264_v46 = vmul.f32 %v1497_v42, %v1263_v44 }
0x1f21   :  { %v1265_v47 = vadd.f32 %v1497_v42, %v1264_v46 }
0x1f23   :  { %v1269_v0 = vsel %vm1268_vm13, %v1497_v42, %v1265_v47 }
0x1f24   :  { %v1274_v50 = vsel %vm1271_vm14, %v1273_v48, %v1269_v0 }
0x1f25   :  { %v1276_v51 = vsel %vm1611_vm5, %v1499_v49, %v1274_v50  ;;  %vm1313_vm5 = vcmask 7168  }
0x1f26   :  { %1279 = vrot.lane.b32.xlu0 %v1276_v51, %s1504_s21  ;;  %v1277_v55 = vmul.f32 %v1276_v51, %v1222_v19 }
0x1f2e   :  { %1297 = vrot.lane.b32.xlu0 %v1372_v52, %s1506_s4 }
0x1f98   :  { %v1280_v53 = vpop.permute.xlu0 %1279 }
0x1f99   :  { %v1282_v54 = vmul.f32 %v1280_v53, %v1276_v51 }
0x1f9b   :  { %1284 = vrot.lane.b32.xlu1 %v1282_v54, %s1505_s22 }
0x1fa0   :  { %v1298_v59 = vpop.permute.xlu0 %1297 }
0x200d   :  { %v1285_v56 = vpop.permute.xlu1 %1284 }
0x200e   :  { %v1287_v57 = vadd.f32 %v1285_v56, %v1277_v55 }
0x2010   :  { %1500 = vtanh.f32 %v1287_v57 }
0x2016   :  { %v1501_v58 = vpop.eup %1500 }
0x2017   :  { %1290 = vrot.lane.b32.xlu2 %v1501_v58, %s1504_s21 }
0x2071   :  { %v1291_v23 = vpop.permute.xlu2 %1290 }
0x2072   :  { %v1293_v60 = vmul.f32 %v1291_v23, %v1276_v51 }
0x2074   :  { %v1300_v61 = vmul.f32 %v1298_v59, %v1293_v60 }
0x2076   :  { %1302 = vrot.lane.b32.xlu1 %v1300_v61, %s1505_s22 }
0x20e8   :  { %v1303_v2 = vpop.permute.xlu1 %1302 }
0x20e9   :  { %v1305_v3 = vsel %vm135_vm9, %v1303_v2, 0.0 }
0x20ea   :  { %1306 = vadd.xlane.f32.xlu2 %v1305_v3 }
0x215d   :  { %v1307_v9 = vpop.xlane.xlu2 %1306 }
0x215e   :  { %v1312_v10 = vadd.f32 %v1373_v8, %v1307_v9 }
0x2160   :  { %1314 = vst.msk [vmem:[%s1902_s9] sm:$0xff] %vm1313_vm5, %v1312_v10 }

</bundles_post_ra>
